<compile_context>
chip_gen: v5e
topology: v5e:2x2
jax: 0.10.0
libtpu: 0.0.40
codegen_flags: <defaults>
</compile_context>

<pallas_src>
import jax
import jax.numpy as jnp
from jax.experimental import pallas as pl
from jax.experimental.pallas import tpu as pltpu

DIMS = 16
HIDDEN = 10
FEAT = 16  # padded feature width (HIDDEN 10 -> 16; DIMS is already 16)


def _round_up(x, m):
    return (x + m - 1) // m * m


def _select_tiling():
    """Pick (batch tile, vmem limit) from the chip's VMEM capacity.

    Worst-case VMEM per pipeline set: input block (TILE_B, 16) f32 is lane-padded to
    128 lanes (~TILE_B*512 B), output block (16, TILE_B) f32 is dense (~TILE_B*64 B),
    each double-buffered.  16384 -> ~18 MiB (safe on v7x's 64 MiB), 32768 -> ~36 MiB
    (fine on v5e/v6e's 128 MiB once the scoped limit is raised).
    """
    vmem_bytes = 64 << 20
    try:
        vmem_bytes = pltpu.get_tpu_info().vmem_capacity_bytes
    except Exception:
        pass
    if vmem_bytes >= (100 << 20):   # v5e / v6e: 128 MiB physical VMEM
        return 32768, 64 << 20
    return 16384, 40 << 20          # v7x: 64 MiB physical VMEM


def _mlp_kernel(x_ref, w_ref, b_ref, o_ref):
    # x_ref: (TILE_B, FEAT) batch-major input block (as stored in HBM, no wrapper copy).
    # w_ref: (3, FEAT, FEAT) weights, (out, in) layout, pre-scaled by 0.4, zero-padded.
    # b_ref: (3, FEAT, 1)    biases, pre-scaled by 0.4, zero-padded.
    # o_ref: (FEAT, TILE_B)  feature-major, lane-dense output block.
    x = x_ref[...]
    # Layer 1: contract the shared feature axis of w (out,in) and x (batch,in)
    # -> feature-major (FEAT, TILE_B) activation, no explicit transpose of x needed.
    h = jax.lax.dot_general(
        w_ref[0], x, (((1,), (1,)), ((), ())), preferred_element_type=jnp.float32
    )
    h = jnp.cos(h + b_ref[0])
    h = jnp.cos(jnp.dot(w_ref[1], h, preferred_element_type=jnp.float32) + b_ref[1])
    h = jnp.cos(jnp.dot(w_ref[2], h, preferred_element_type=jnp.float32) + b_ref[2])
    o_ref[...] = h.astype(o_ref.dtype)


def init_raw_params(key, std=5.0):
    """torch-layout params: w1 (10,16), w2 (10,10), w3 (16,10); biases (out,)."""
    k1, k2, k3, kb1, kb2, kb3 = jax.random.split(key, 6)
    w1 = std * jax.random.normal(k1, (HIDDEN, DIMS), jnp.float32)
    w2 = std * jax.random.normal(k2, (HIDDEN, HIDDEN), jnp.float32)
    w3 = std * jax.random.normal(k3, (DIMS, HIDDEN), jnp.float32)
    b1 = jax.random.uniform(kb1, (HIDDEN,), jnp.float32,
                            -1.0 / jnp.sqrt(DIMS), 1.0 / jnp.sqrt(DIMS))
    b2 = jax.random.uniform(kb2, (HIDDEN,), jnp.float32,
                            -1.0 / jnp.sqrt(HIDDEN), 1.0 / jnp.sqrt(HIDDEN))
    b3 = jax.random.uniform(kb3, (DIMS,), jnp.float32,
                            -1.0 / jnp.sqrt(HIDDEN), 1.0 / jnp.sqrt(HIDDEN))
    return (w1, b1, w2, b2, w3, b3)


def prepare_params(raw_params):
    """Fold the 0.4 scale into the params, zero-pad to FEAT, and pack into 2 operands.

    Padded hidden rows evaluate to cos(0)=1, but the corresponding columns of the next
    layer's padded weight are zero, so the padding never affects valid outputs.
    """
    w1, b1, w2, b2, w3, b3 = raw_params
    w_packed = jnp.zeros((3, FEAT, FEAT), jnp.float32)
    b_packed = jnp.zeros((3, FEAT, 1), jnp.float32)
    for l, (w, b) in enumerate(((w1, b1), (w2, b2), (w3, b3))):
        w_packed = w_packed.at[l, : w.shape[0], : w.shape[1]].set(0.4 * w)
        b_packed = b_packed.at[l, : b.shape[0], 0].set(0.4 * b)
    return w_packed, b_packed


def _jnp_forward(y, w_packed, b_packed):
    """Small-batch fallback: same padded math, plain XLA (no kernel launch)."""
    h = y
    for l in range(3):
        h = jnp.cos(h @ w_packed[l].T + b_packed[l, :, 0])
    return h[:, :DIMS]


def nn_forward(t, y, params, *, min_pallas_batch=256):
    """Pallas implementation of NN.forward. `t` is unused (matches the module)."""
    del t  # TODO(synk): self.nfe counter and unused self.A buffer are Python-side
    #                    state with no kernel-side role; intentionally not modeled.
    w_packed, b_packed = params
    B = y.shape[0]
    y = y.astype(jnp.float32)

    if B < min_pallas_batch:
        return _jnp_forward(y, w_packed, b_packed)

    target_tile_b, vmem_limit = _select_tiling()
    b128 = _round_up(B, 128)
    tile_b = min(target_tile_b, b128)
    # Keep >= 2 grid programs when the batch allows, so the parallel grid axis can be
    # sharded across both TensorCores on v7x (no-op on single-TC chips).
    if b128 // tile_b < 2 and b128 >= 2 * 128:
        tile_b = _round_up(b128 // 2, 128)
    b_pad = _round_up(b128, tile_b)
    grid = (b_pad // tile_b,)

    # Input stays batch-major (b_pad, FEAT): no wrapper transpose. Pad only if needed.
    if b_pad == B:
        x = y
    else:
        x = jnp.zeros((b_pad, FEAT), jnp.float32).at[:B].set(y)

    cost = pl.CostEstimate(
        flops=2 * 3 * FEAT * FEAT * b_pad,
        transcendentals=3 * FEAT * b_pad,
        bytes_accessed=4 * (2 * FEAT * b_pad + 3 * FEAT * FEAT + 3 * FEAT),
    )

    out_t = pl.pallas_call(
        _mlp_kernel,
        out_shape=jax.ShapeDtypeStruct((FEAT, b_pad), jnp.float32),
        grid=grid,
        in_specs=[
            pl.BlockSpec((tile_b, FEAT), lambda i: (i, 0)),      # batch-major input
            pl.BlockSpec((3, FEAT, FEAT), lambda i: (0, 0, 0)),  # resident weights
            pl.BlockSpec((3, FEAT, 1), lambda i: (0, 0, 0)),     # resident biases
        ],
        out_specs=pl.BlockSpec((FEAT, tile_b), lambda i: (0, i)),  # lane-dense output
        compiler_params=pltpu.CompilerParams(
            dimension_semantics=("parallel",),
            vmem_limit_bytes=vmem_limit,
        ),
        cost_estimate=cost,
    )(x, w_packed, b_packed)

    # One remaining layout op: feature-major (FEAT, b_pad) -> module's (B, DIMS).
    return out_t[:DIMS, :B].T


def _ref_forward(y, raw_params):
    w1, b1, w2, b2, w3, b3 = raw_params
    y = jnp.cos(0.4 * (y @ w1.T + b1))
    y = jnp.cos(0.4 * (y @ w2.T + b2))
    y = jnp.cos(0.4 * (y @ w3.T + b3))
    return y


if __name__ == "__main__":
    key = jax.random.PRNGKey(0)
    kp, ky = jax.random.split(key)
    raw_params = init_raw_params(kp, std=5.0)
    params = prepare_params(raw_params)
    t = jnp.float32(0.0)  # unused, matches forward(t, y) signature

    # Pallas path (batch large enough to fill lane-dense tiles; grid splits to 2).
    batch = 512
    y = jax.random.normal(ky, (batch, DIMS), jnp.float32)
    out = nn_forward(t, y, params)
    jax.block_until_ready(out)
    ref = _ref_forward(y, raw_params)
    assert out.shape == (batch, DIMS)
    err = float(jnp.max(jnp.abs(out - ref)))
    assert jnp.allclose(out, ref, atol=5e-4, rtol=1e-3), err

    # Small-batch fallback path (same semantics, no kernel launch).
    y_small = jax.random.normal(jax.random.PRNGKey(1), (8, DIMS), jnp.float32)
    out_small = nn_forward(t, y_small, params)
    jax.block_until_ready(out_small)
    ref_small = _ref_forward(y_small, raw_params)
    assert out_small.shape == (8, DIMS)
    assert jnp.allclose(out_small, ref_small, atol=5e-4, rtol=1e-3)

    print("KERNEL_OK")
</pallas_src>

<mosaic_0001>
module attributes {stable_mosaic.version = 11 : i64} {
  func.func @_mlp_kernel(%arg0: i32, %arg1: memref<256x16xf32, #tpu.memory_space<vmem>>, %arg2: memref<3x16x16xf32, #tpu.memory_space<vmem>>, %arg3: memref<3x16x1xf32, #tpu.memory_space<vmem>>, %arg4: memref<16x256xf32, #tpu.memory_space<vmem>>) attributes {dimension_semantics = [#tpu.dimension_semantics<parallel>], iteration_bounds = array<i64: 2>, scalar_prefetch = 0 : i64, scratch_operands = 0 : i64, tpu.core_type = #tpu.core_type<tc>, window_params = [{transform_indices = @transform_0, window_bounds = array<i64: 256, 16>}, {pipeline_mode = #tpu.pipeline_mode<synchronous>, transform_indices = @transform_1, window_bounds = array<i64: 3, 16, 16>}, {pipeline_mode = #tpu.pipeline_mode<synchronous>, transform_indices = @transform_2, window_bounds = array<i64: 3, 16, 1>}, {transform_indices = @transform_3, window_bounds = array<i64: 16, 256>}]} {
    %c0 = arith.constant 0 : index
    %c0_0 = arith.constant 0 : index
    %0 = vector.load %arg1[%c0, %c0_0] : memref<256x16xf32, #tpu.memory_space<vmem>>, vector<256x16xf32>
    %c0_1 = arith.constant 0 : index
    %c0_2 = arith.constant 0 : index
    %c0_3 = arith.constant 0 : index
    %1 = vector.load %arg2[%c0_1, %c0_2, %c0_3] : memref<3x16x16xf32, #tpu.memory_space<vmem>>, vector<1x16x16xf32>
    %2 = vector.shape_cast %1 : vector<1x16x16xf32> to vector<16x16xf32>
    %cst = arith.constant dense<0.000000e+00> : vector<16x256xf32>
    %3 = tpu.matmul %2, %0, %cst {dimension_numbers = #tpu.dot_dimension_numbers<[1], [1], [0], [0], [0, 0, 1, 0], [], []>} : vector<16x16xf32>, vector<256x16xf32>, vector<16x256xf32> -> vector<16x256xf32>
    %c0_4 = arith.constant 0 : index
    %c0_5 = arith.constant 0 : index
    %c0_6 = arith.constant 0 : index
    %4 = vector.load %arg3[%c0_4, %c0_5, %c0_6] : memref<3x16x1xf32, #tpu.memory_space<vmem>>, vector<1x16x1xf32>
    %5 = vector.shape_cast %4 : vector<1x16x1xf32> to vector<16x1xf32>
    %6 = vector.broadcast %5 : vector<16x1xf32> to vector<16x256xf32>
    %7 = arith.addf %3, %6 : vector<16x256xf32>
    %8 = math.cos %7 : vector<16x256xf32>
    %c1 = arith.constant 1 : index
    %c0_7 = arith.constant 0 : index
    %c0_8 = arith.constant 0 : index
    %9 = vector.load %arg2[%c1, %c0_7, %c0_8] : memref<3x16x16xf32, #tpu.memory_space<vmem>>, vector<1x16x16xf32>
    %10 = vector.shape_cast %9 : vector<1x16x16xf32> to vector<16x16xf32>
    %cst_9 = arith.constant dense<0.000000e+00> : vector<16x256xf32>
    %11 = tpu.matmul %10, %8, %cst_9 {dimension_numbers = #tpu.dot_dimension_numbers<[1], [0], [0], [1], [0, 0, 1, 1], [], []>} : vector<16x16xf32>, vector<16x256xf32>, vector<16x256xf32> -> vector<16x256xf32>
    %c1_10 = arith.constant 1 : index
    %c0_11 = arith.constant 0 : index
    %c0_12 = arith.constant 0 : index
    %12 = vector.load %arg3[%c1_10, %c0_11, %c0_12] : memref<3x16x1xf32, #tpu.memory_space<vmem>>, vector<1x16x1xf32>
    %13 = vector.shape_cast %12 : vector<1x16x1xf32> to vector<16x1xf32>
    %14 = vector.broadcast %13 : vector<16x1xf32> to vector<16x256xf32>
    %15 = arith.addf %11, %14 : vector<16x256xf32>
    %16 = math.cos %15 : vector<16x256xf32>
    %c2 = arith.constant 2 : index
    %c0_13 = arith.constant 0 : index
    %c0_14 = arith.constant 0 : index
    %17 = vector.load %arg2[%c2, %c0_13, %c0_14] : memref<3x16x16xf32, #tpu.memory_space<vmem>>, vector<1x16x16xf32>
    %18 = vector.shape_cast %17 : vector<1x16x16xf32> to vector<16x16xf32>
    %cst_15 = arith.constant dense<0.000000e+00> : vector<16x256xf32>
    %19 = tpu.matmul %18, %16, %cst_15 {dimension_numbers = #tpu.dot_dimension_numbers<[1], [0], [0], [1], [0, 0, 1, 1], [], []>} : vector<16x16xf32>, vector<16x256xf32>, vector<16x256xf32> -> vector<16x256xf32>
    %c2_16 = arith.constant 2 : index
    %c0_17 = arith.constant 0 : index
    %c0_18 = arith.constant 0 : index
    %20 = vector.load %arg3[%c2_16, %c0_17, %c0_18] : memref<3x16x1xf32, #tpu.memory_space<vmem>>, vector<1x16x1xf32>
    %21 = vector.shape_cast %20 : vector<1x16x1xf32> to vector<16x1xf32>
    %22 = vector.broadcast %21 : vector<16x1xf32> to vector<16x256xf32>
    %23 = arith.addf %19, %22 : vector<16x256xf32>
    %24 = math.cos %23 : vector<16x256xf32>
    %c0_19 = arith.constant 0 : index
    %c0_20 = arith.constant 0 : index
    %25 = vector.load %arg4[%c0_19, %c0_20] : memref<16x256xf32, #tpu.memory_space<vmem>>, vector<16x256xf32>
    tpu.vector_store %arg4[%c0_19, %c0_20], %24 {strides = array<i32>} : memref<16x256xf32, #tpu.memory_space<vmem>>, vector<16x256xf32>,
    return
  }
  func.func @transform_0(%arg0: i32) -> (i32, i32) {
    %c0_i32 = arith.constant 0 : i32
    %c0_i32_0 = arith.constant 0 : i32
    return %arg0, %c0_i32 : i32, i32
  }
  func.func @transform_1(%arg0: i32) -> (i32, i32, i32) {
    %c0_i32 = arith.constant 0 : i32
    %c0_i32_0 = arith.constant 0 : i32
    %c0_i32_1 = arith.constant 0 : i32
    %c0_i32_2 = arith.constant 0 : i32
    return %c0_i32, %c0_i32_0, %c0_i32_1 : i32, i32, i32
  }
  func.func @transform_2(%arg0: i32) -> (i32, i32, i32) {
    %c0_i32 = arith.constant 0 : i32
    %c0_i32_0 = arith.constant 0 : i32
    %c0_i32_1 = arith.constant 0 : i32
    %c0_i32_2 = arith.constant 0 : i32
    return %c0_i32, %c0_i32_0, %c0_i32_1 : i32, i32, i32
  }
  func.func @transform_3(%arg0: i32) -> (i32, i32) {
    %c0_i32 = arith.constant 0 : i32
    %c0_i32_0 = arith.constant 0 : i32
    return %c0_i32, %arg0 : i32, i32
  }
}

</mosaic_0001>

<bundles_post_ra>
// kernel: tpu_custom_call.1
= control target key start
LH: loop header
LB: loop body
LE: loop exit
PB: predicated region body
PF: predicated region fallthrough
CT: control target
= control target key end

     0   :  { %8 = vsyncpa [#allocation3], 0  ;;  %s4251_s0 = inlined_call_operand.vmem [shape: f32[512,16], index: 0, kind: input, shape index: {}]   ;;  %s4252_s1 = inlined_call_operand.vmem [shape: f32[3,16,16], index: 1, kind: input, shape index: {}]   ;;  %s4253_s2 = inlined_call_operand.vmem [shape: f32[3,16,1], index: 2, kind: input, shape index: {}]   ;;  %s4254_s3 = inlined_call_operand.hbm [shape: f32[16,512], index: 3, kind: output, shape index: {}]  }
   0x1   :  { %10 = vsyncpa [#allocation3 + $0x1], 0  ;;  %s2680_s12 = smov 0   ;;  %s2682_s13 = smov 0  }
   0x2   :  { %s2684_s14 = smov 0   ;;  %s2686_s15 = smov 0  }
   0x3 LB: > { %s2701_s16 = sadd.s32 4294967295, %s2648_s15   ;;  %s2433_s17 = sadd.s32 4294967294, %s2648_s15   ;;  %s2648_s15 = sphi %s2686_s15, %s4284_s15   ;;  %s2644_s14 = sphi %s2684_s14, %s4283_s14   ;;  %s2640_s13 = sphi %s2682_s13, %s4282_s13   ;;  %s2636_s12 = sphi %s2680_s12, %s4281_s12  }
   0x4   : > { %s2705_s18 = sadd.s32 1, %s2648_s15   ;;  %s91_s19 = sadd.s32 1, %s2644_s14 }
   0x5   : > { %s88_s20 = ssub.s32 %s2648_s15, %s2705_s18  ;;  %p101_p0 = scmp.ne.s32.totalorder %s2644_s14, %s2640_s13 }
   0x6   : > { %p89_p1 = scmp.eq.s32.totalorder %s88_s20, 0  ;;  %p102_p2 = scmp.eq.s32.totalorder %s2701_s16, 1 }
   0x7   : > { %p107_p3 = scmp.ne.s32.totalorder %s2640_s13, %s2636_s12  ;;  %p108_p4 = scmp.eq.s32.totalorder %s2433_s17, 1 }
   0x8   : > { %s2716_s21 = scalar_select %p89_p1, %s2644_s14, %s91_s19  }
   0x9   : > { %p2718_p5 = por %p102_p2, %p101_p0  ;;  %p2722_p6 = por %p108_p4, %p107_p3 }
   0xa   : > { %p2436_p7 = scmp.ge.s32.totalorder %s2648_s15, 1  ;;  %p141_p8 = scmp.lt.s32.totalorder %s2648_s15, 3 }
   0xc   : > { %p142_p9 = pnand %p2436_p7, %p141_p8 }
   0xd   : > { %s2438_s24 = sshll.u32 (!%p142_p9), %s2701_s16, 5  ;;  %s162_s8 = sand.u32 (!%p142_p9), 1, %s2640_s13  }
   0xe   : > { %145 = sbr.rel (%p142_p9) target bundleno = 1029 (0x405), region = 32  ;;  %p166_p10 = scmp.lt.s32.totalorder (!%p142_p9), %s2438_s24, 63 }
   0xf   : > { %s2437_s9 = sshll.u32 (!%p142_p9), %s162_s8, 5  ;;  %s2533_s11 = sshll.u32 (!%p142_p9), %s2701_s16, 4 }
  0x10   : > { %s4051_s10 = scalar_lea.vmem (!%p142_p9), [#allocation2], %s2437_s9  ;;  %s2367_s20 = scalar_lea.hbm (!%p142_p9), %s4254_s3, %s2533_s11 }
  0x11   : > { %s2356_s16 = scalar_lea.sflag (!%p142_p9), [#allocation3], %s162_s8  ;;  %s2606_s30 = scalar_lea.hbm (!%p142_p9), %s4254_s3, 64 }
  0x13   : > { %s4286_s24 = smov (!%p166_p10, %s2438_s24), 63  ;;  %vm218_vm0 = vcmask 130048   ;;  %v207_v18 = vld [vmem:[%s4253_s2 + $0x8] sm:$0xff]  ;;  %v2650_v21 = vmov 0   ;;  %v206_v24 = vld [vmem:[%s4253_s2] sm:$0xff] }
  0x14   : > { %s2439_s25 = sshll.u32 %s4286_s24, 3  ;;  %2583 = vset.pattern.permute.xlu0 %v2650_v21  ;;  %2584 = vset.pattern.permute.xlu1 %v2650_v21  ;;  %v204_v35 = vld [vmem:[%s4252_s1] sm:$0xff]  ;;  %v205_v36 = vld [vmem:[%s4252_s1 + $0x8] sm:$0xff]  ;;  %s2368_s24 = sshll.u32 %s4051_s10, 4  ;;  %s4217_s24 = int_to_ptr.vmem [resolvable:$true] %s2368_s24 }
  0x15   : > { %s2732_s28 = scalar_lea.vmem %s4251_s0, %s2439_s25  ;;  %215 = vperm.xlu0 %2583, %v207_v18   ;;  %2585 = vset.pattern.permute.xlu2 %v2650_v21  ;;  %s2370_s25 = sshll.u32 %s2367_s20, 4  ;;  %s2371_s25 = int_to_ptr.hbm [resolvable:$true] %s2370_s25 }
  0x16   : > { %v187_v0 = vld [vmem:[%s2732_s28 + $0x78] sm:$0xff]  ;;  %v186_v2 = vld [vmem:[%s2732_s28 + $0x70] sm:$0xff]  ;;  %v185_v4 = vld [vmem:[%s2732_s28 + $0x68] sm:$0xff]  ;;  %s2600_s26 = sshra.s32 %s2371_s25, 4  ;;  %s2601_s26 = int_to_ptr.hbm [resolvable:$true] %s2600_s26 }
  0x17   : > { %v203_v1 = vld [vmem:[%s2732_s28 + $0xf8] sm:$0xff]  ;;  %2440 = vmatpush.xpose.msk.msra.mxu0 %vm218_vm0, %v187_v0  ;;  %v202_v3 = vld [vmem:[%s2732_s28 + $0xf0] sm:$0xff]  ;;  %v201_v5 = vld [vmem:[%s2732_s28 + $0xe8] sm:$0xff]  ;;  %s2602_s27 = scalar_lea.hbm %s2601_s26, 32  ;;  %p2607_p0 = scmp.lt.s32.totalorder %s2601_s26, %s4254_s3 }
  0x18   : > { %2458 = vmatpush.xpose.msk.msra.mxu1 %vm218_vm0, %v203_v1  ;;  %v184_v6 = vld [vmem:[%s2732_s28 + $0x60] sm:$0xff]  ;;  %v183_v8 = vld [vmem:[%s2732_s28 + $0x58] sm:$0xff]  ;;  %v182_v10 = vld [vmem:[%s2732_s28 + $0x50] sm:$0xff]  ;;  %p2603_p11 = scmp.ne.s32.totalorder %s2601_s26, %s2602_s27  ;;  %p2608_p1 = scmp.lt.s32.totalorder %s2606_s30, %s2602_s27 }
  0x19   : > { %v200_v7 = vld [vmem:[%s2732_s28 + $0xe0] sm:$0xff]  ;;  %v199_v9 = vld [vmem:[%s2732_s28 + $0xd8] sm:$0xff]  ;;  %v198_v11 = vld [vmem:[%s2732_s28 + $0xd0] sm:$0xff] }
  0x1a   : > { %v181_v12 = vld [vmem:[%s2732_s28 + $0x48] sm:$0xff]  ;;  %v180_v14 = vld [vmem:[%s2732_s28 + $0x40] sm:$0xff]  ;;  %v179_v16 = vld [vmem:[%s2732_s28 + $0x38] sm:$0xff]  ;;  %p2604_p12 = pnand %p2603_p11, %p2718_p5  ;;  %p2609_p2 = por %p2608_p1, %p2607_p0 }
  0x1b   : > { %2441 = vmatpush.xpose.msk.msra.mxu0 %vm218_vm0, %v186_v2  ;;  %v197_v13 = vld [vmem:[%s2732_s28 + $0xc8] sm:$0xff]  ;;  %v196_v15 = vld [vmem:[%s2732_s28 + $0xc0] sm:$0xff]  ;;  %v195_v17 = vld [vmem:[%s2732_s28 + $0xb8] sm:$0xff] }
  0x1c   : > { %2459 = vmatpush.xpose.msk.msra.mxu1 %vm218_vm0, %v202_v3  ;;  %v178_v19 = vld [vmem:[%s2732_s28 + $0x30] sm:$0xff]  ;;  %v177_v22 = vld [vmem:[%s2732_s28 + $0x28] sm:$0xff]  ;;  %v176_v25 = vld [vmem:[%s2732_s28 + $0x20] sm:$0xff]  ;;  %p2605_p13 = pneg %p2604_p12 }
  0x1d   : > { %v194_v20 = vld [vmem:[%s2732_s28 + $0xb0] sm:$0xff]  ;;  %v193_v23 = vld [vmem:[%s2732_s28 + $0xa8] sm:$0xff]  ;;  %v192_v26 = vld [vmem:[%s2732_s28 + $0xa0] sm:$0xff]  ;;  %210 = vperm.xlu0 %2583, %v206_v24  }
  0x1e   : > { %v175_v27 = vld [vmem:[%s2732_s28 + $0x18] sm:$0xff]  ;;  %v174_v29 = vld [vmem:[%s2732_s28 + $0x10] sm:$0xff]  ;;  %v173_v31 = vld [vmem:[%s2732_s28 + $0x8] sm:$0xff]  ;;  %p2610_p3 = pnand %p2609_p2, %p2605_p13 }
  0x1f   : > { %2442 = vmatpush.xpose.msk.msra.mxu0 %vm218_vm0, %v185_v4  ;;  %v191_v28 = vld [vmem:[%s2732_s28 + $0x98] sm:$0xff]  ;;  %v190_v30 = vld [vmem:[%s2732_s28 + $0x90] sm:$0xff]  ;;  %v189_v32 = vld [vmem:[%s2732_s28 + $0x88] sm:$0xff] }
  0x20   : > { %2460 = vmatpush.xpose.msk.msra.mxu1 %vm218_vm0, %v201_v5  ;;  %v172_v33 = vld [vmem:[%s2732_s28] sm:$0xff] }
  0x21   : > { %v188_v34 = vld [vmem:[%s2732_s28 + $0x80] sm:$0xff] }
  0x23   : > { %2443 = vmatpush.xpose.msk.msra.mxu0 %vm218_vm0, %v184_v6 }
  0x24   : > { %2461 = vmatpush.xpose.msk.msra.mxu1 %vm218_vm0, %v200_v7 }
  0x27   : > { %2444 = vmatpush.xpose.msk.msra.mxu0 %vm218_vm0, %v183_v8 }
  0x28   : > { %2462 = vmatpush.xpose.msk.msra.mxu1 %vm218_vm0, %v199_v9 }
  0x2b   : > { %2445 = vmatpush.xpose.msk.msra.mxu0 %vm218_vm0, %v182_v10 }
  0x2c   : > { %2463 = vmatpush.xpose.msk.msra.mxu1 %vm218_vm0, %v198_v11 }
  0x2f   : > { %2446 = vmatpush.xpose.msk.msra.mxu0 %vm218_vm0, %v181_v12  ;;  %v2651_v12 = vmov 2102212464  }
  0x30   : > { %2464 = vmatpush.xpose.msk.msra.mxu1 %vm218_vm0, %v197_v13 }
  0x33   : > { %2447 = vmatpush.xpose.msk.msra.mxu0 %vm218_vm0, %v180_v14 }
  0x34   : > { %2465 = vmatpush.xpose.msk.msra.mxu1 %vm218_vm0, %v196_v15 }
  0x37   : > { %2448 = vmatpush.xpose.msk.msra.mxu0 %vm218_vm0, %v179_v16  ;;  %v2652_v16 = vmov 920167782  }
  0x38   : > { %2466 = vmatpush.xpose.msk.msra.mxu1 %vm218_vm0, %v195_v17 }
  0x3b   : > { %2449 = vmatpush.xpose.msk.msra.mxu0 %vm218_vm0, %v178_v19 }
  0x3c   : > { %2467 = vmatpush.xpose.msk.msra.mxu1 %vm218_vm0, %v194_v20 }
  0x3f   : > { %2450 = vmatpush.xpose.msk.msra.mxu0 %vm218_vm0, %v177_v22 }
  0x40   : > { %2468 = vmatpush.xpose.msk.msra.mxu1 %vm218_vm0, %v193_v23 }
  0x43   : > { %2451 = vmatpush.xpose.msk.msra.mxu0 %vm218_vm0, %v176_v25 }
  0x44   : > { %2469 = vmatpush.xpose.msk.msra.mxu1 %vm218_vm0, %v192_v26 }
  0x47   : > { %2452 = vmatpush.xpose.msk.msra.mxu0 %vm218_vm0, %v175_v27  ;;  %v2653_v27 = vmov 683565275  }
  0x48   : > { %2470 = vmatpush.xpose.msk.msra.mxu1 %vm218_vm0, %v191_v28 }
  0x4b   : > { %2453 = vmatpush.xpose.msk.msra.mxu0 %vm218_vm0, %v174_v29  ;;  %v2654_v29 = vmov 2475754826  }
  0x4c   : > { %2471 = vmatpush.xpose.msk.msra.mxu1 %vm218_vm0, %v190_v30 }
  0x4f   : > { %2454 = vmatpush.xpose.msk.msra.mxu0 %vm218_vm0, %v173_v31  ;;  %v2655_v31 = vmov 2131351028  }
  0x50   : > { %2472 = vmatpush.xpose.msk.msra.mxu1 %vm218_vm0, %v189_v32 }
  0x53   : > { %2455 = vmatpush.xpose.msk.msra.mxu0 %vm218_vm0, %v172_v33 }
  0x54   : > { %2473 = vmatpush.xpose.msk.msra.mxu1 %vm218_vm0, %v188_v34 }
  0x56   : > { %2456 = vmatmul.msk.f32.vlgmr.msra.gmra.mxu0 %vm218_vm0, %v204_v35 }
  0x57   : > { %2474 = vmatmul.msk.f32.vlgmr.msra.gmra.mxu1 %vm218_vm0, %v204_v35 }
  0x5e   : > { %2457 = vmatmul.msk.f32.gmra.mxu0 %vm218_vm0, %v205_v36 }
  0x5f   : > { %2475 = vmatmul.msk.f32.gmra.mxu1 %vm218_vm0, %v205_v36 }
  0x87   : > { %v216_v37 = vpop.permute.xlu0 %215 }
  0x8f   : > { %v211_v38 = vpop.permute.xlu0 %210 }
  0xd3   : > { %v338_v39 = vpop.f32.mrf.mxu0 }
  0xd4   : > { %v361_v40 = vpop.f32.mrf.mxu1  ;;  %v2817_v41 = vadd.f32 %v338_v39, %v211_v38  ;;  %v2656_v39 = vmov 1326507024  }
  0xd5   : > { %v2819_v42 = vadd.f32 %v361_v40, %v211_v38 }
  0xd6   : > { %v370_v43 = vand.u32 2139095040, %v2817_v41 }
  0xd7   : > { %v524_v44 = vand.u32 2139095040, %v2819_v42 }
  0xd8   : > { %v371_v45 = vshrl.u32 %v370_v43, 23 }
  0xd9   : > { %v525_v46 = vshrl.u32 %v524_v44, 23 }
  0xda   : > { %v2476_v47 = vadd.s32 4294967169, %v371_v45 }
  0xdb   : > { %v2479_v48 = vadd.s32 4294967169, %v525_v46  ;;  %v341_v49 = vpop.f32.mrf.mxu0 }
  0xdc   : > { %v364_v50 = vpop.f32.mrf.mxu1  ;;  %v377_v51 = vadd.s32 1, %v2476_v47  ;;  %v2823_v52 = vadd.f32 %v341_v49, %v216_v37 }
  0xdd   : > { %v2825_v53 = vadd.f32 %v364_v50, %v216_v37  ;;  %v531_v54 = vadd.s32 1, %v2479_v48 }
  0xde   : > { %v678_v55 = vand.u32 2139095040, %v2823_v52  ;;  %v675_v57 = vand.u32 2147483647, %v2823_v52  ;;  %vm378_vm1 = vcmp.gt.s32.totalorder %v377_v51, 0 }
  0xdf   : > { %v832_v56 = vand.u32 2139095040, %v2825_v53  ;;  %vm532_vm2 = vcmp.gt.s32.totalorder %v531_v54, 0  ;;  %v379_v61 = vsel %vm378_vm1, %v377_v51, 0  ;;  %v829_v25 = vand.u32 2147483647, %v2825_v53 }
  0xe0   : > { %v679_v58 = vshrl.u32 %v678_v55, 23  ;;  %v682_v60 = vand.u32 8388607, %v675_v57  ;;  %v533_v62 = vsel %vm532_vm2, %v531_v54, 0  ;;  %v2832_v2 = vand.u32 31, %v379_v61 }
  0xe1   : > { %v833_v59 = vshrl.u32 %v832_v56, 23  ;;  %v2834_v5 = vand.u32 31, %v533_v62  ;;  %v2838_v7 = vshrl.u32 %v379_v61, 5  ;;  %v2840_v8 = vshrl.u32 %v533_v62, 5 }
  0xe2   : > { %v2482_v63 = vadd.s32 4294967169, %v679_v58  ;;  %v683_v1 = vor.u32 8388608, %v682_v60  ;;  %v2843_v11 = vsub.s32 32, %v2832_v2  ;;  %v2847_v13 = vshll.u32 %v2651_v12, %v2832_v2 }
  0xe3   : > { %v2485_v0 = vadd.s32 4294967169, %v833_v59  ;;  %v2853_v17 = vshll.u32 %v2652_v16, %v2832_v2  ;;  %v2856_v18 = vsub.s32 32, %v2834_v5  ;;  %v2860_v19 = vshll.u32 %v2651_v12, %v2834_v5 }
  0xe4   : > { %v685_v3 = vadd.s32 1, %v2482_v63  ;;  %v2836_v6 = vshll.u32 %v683_v1, 8  ;;  %v2885_v54 = vshll.u32 %v2652_v16, %v2834_v5  ;;  %v2889_v58 = vand.u32 8388607, %v829_v25 }
  0xe5   : > { %v839_v4 = vadd.s32 1, %v2485_v0  ;;  %vm402_vm15 = vcmp.lt.s32.totalorder %v2838_v7, 4 }
  0xe6   : > { %vm686_vm3 = vcmp.gt.s32.totalorder %v685_v3, 0  ;;  %v724_v23 = vand.u32 65535, %v2836_v6  ;;  %v2864_v24 = vshrl.u32 %v2836_v6, 16 }
  0xe7   : > { %vm840_vm4 = vcmp.gt.s32.totalorder %v839_v4, 0  ;;  %v687_v9 = vsel %vm686_vm3, %v685_v3, 0 }
  0xe8   : > { %v841_v10 = vsel %vm840_vm4, %v839_v4, 0  ;;  %v689_v14 = vand.u32 31, %v687_v9  ;;  %v688_v20 = vshrl.u32 %v687_v9, 5 }
  0xe9   : > { %v2849_v15 = vand.u32 31, %v841_v10 }
  0xea   : > { %v690_v22 = vsub.s32 32, %v689_v14  ;;  %v692_v28 = vshll.u32 %v2653_v27, %v689_v14  ;;  %v695_v30 = vshll.u32 %v2654_v29, %v689_v14  ;;  %v698_v32 = vshll.u32 %v2655_v31, %v689_v14 }
  0xeb   : > { %v2868_v26 = vsub.s32 32, %v2849_v15  ;;  %v701_v36 = vshll.u32 %v2651_v12, %v689_v14  ;;  %v704_v38 = vshll.u32 %v2652_v16, %v689_v14  ;;  %vm707_vm5 = vcmp.lt.s32.totalorder %v688_v20, 1 }
  0xec   : > { %v693_v33 = vshrl.u32 %v2654_v29, %v690_v22  ;;  %v696_v34 = vshrl.u32 %v2655_v31, %v690_v22  ;;  %v699_v35 = vshrl.u32 %v2651_v12, %v690_v22  ;;  %v702_v37 = vshrl.u32 %v2652_v16, %v690_v22 }
  0xed   : > { %v705_v40 = vshrl.u32 %v2656_v39, %v690_v22  ;;  %v691_v43 = vshrl.u32 %v2653_v27, %v690_v22  ;;  %vm708_vm6 = vcmp.lt.s32.totalorder %v688_v20, 2  ;;  %vm710_vm7 = vcmp.lt.s32.totalorder %v688_v20, 4 }
  0xee   : > { %v694_v44 = vor.u32 %v693_v33, %v692_v28  ;;  %v697_v45 = vor.u32 %v696_v34, %v695_v30  ;;  %v700_v46 = vor.u32 %v699_v35, %v698_v32  ;;  %v703_v47 = vor.u32 %v702_v37, %v701_v36 }
  0xef   : > { %v706_v48 = vor.u32 %v705_v40, %v704_v38  ;;  %vm709_vm8 = vcmp.lt.s32.totalorder %v688_v20, 3  ;;  %v846_v1 = vshll.u32 %v2653_v27, %v2849_v15  ;;  %v847_v3 = vshrl.u32 %v2654_v29, %v2868_v26 }
  0xf0   : > { %v712_v49 = vsel %vm710_vm7, %v700_v46, 2102212464  ;;  %v715_v50 = vsel %vm707_vm5, %v694_v44, %v697_v45  ;;  %v719_v51 = vsel %vm707_vm5, %v697_v45, %v700_v46  ;;  %v716_v55 = vsel %vm710_vm7, %v703_v47, 920167782 }
  0xf1   : > { %v720_v56 = vsel %vm710_vm7, %v706_v48, 1326507024  ;;  %v711_v59 = vsel %vm707_vm5, %v691_v43, %v694_v44  ;;  %v713_v60 = vsel %vm709_vm8, %v697_v45, %v712_v49  ;;  %v717_v61 = vsel %vm709_vm8, %v700_v46, %v716_v55 }
  0xf2   : > { %v721_v62 = vsel %vm709_vm8, %v703_v47, %v720_v56  ;;  %v718_v63 = vsel %vm708_vm6, %v715_v50, %v717_v61  ;;  %v2900_v28 = vshrl.u32 %v2652_v16, %v2843_v11  ;;  %v2902_v30 = vshrl.u32 %v841_v10, 5 }
  0xf3   : > { %v722_v0 = vsel %vm708_vm6, %v719_v51, %v721_v62  ;;  %v748_v14 = vand.u32 65535, %v718_v63  ;;  %v749_v22 = vshrl.u32 %v718_v63, 16  ;;  %v2905_v32 = vsel %vm708_vm6, %v711_v59, %v713_v60 }
  0xf4   : > { %v726_v4 = vand.u32 65535, %v722_v0  ;;  %v727_v9 = vshrl.u32 %v722_v0, 16  ;;  %v837_v33 = vor.u32 8388608, %v2889_v58  ;;  %v2909_v36 = vor.u32 %v847_v3, %v846_v1 }
  0xf5   : > { %v849_v37 = vshll.u32 %v2654_v29, %v2849_v15  ;;  %v751_v38 = vmul.u32 %v749_v22, %v724_v23  ;;  %v752_v40 = vmul.u32 %v748_v14, %v2864_v24  ;;  %v850_v10 = vshrl.u32 %v2655_v31, %v2868_v26 }
  0xf6   : > { %v729_v34 = vmul.u32 %v727_v9, %v724_v23  ;;  %v730_v35 = vmul.u32 %v726_v4, %v2864_v24  ;;  %v852_v20 = vshll.u32 %v2655_v31, %v2849_v15  ;;  %v728_v43 = vmul.u32 %v726_v4, %v724_v23 }
  0xf7   : > { %v731_v44 = vmul.u32 %v727_v9, %v2864_v24  ;;  %v750_v46 = vmul.u32 %v748_v14, %v724_v23  ;;  %v753_v49 = vmul.u32 %v749_v22, %v2864_v24  ;;  %v754_v50 = vshll.u32 %v751_v38, 16 }
  0xf8   : > { %v732_v45 = vshll.u32 %v729_v34, 16  ;;  %v733_v47 = vshrl.u32 %v729_v34, 16  ;;  %v734_v48 = vshll.u32 %v730_v35, 16  ;;  %v735_v51 = vshrl.u32 %v730_v35, 16 }
  0xf9   : > { %v756_v56 = vshll.u32 %v752_v40, 16  ;;  %vm758_vm10 = vc.u32 %v750_v46, %v754_v50  ;;  %v760_v60 = vadd.s32 %v754_v50, %v750_v46  ;;  %v853_v61 = vshrl.u32 %v2651_v12, %v2868_v26 }
  0xfa   : > { %vm736_vm9 = vc.u32 %v728_v43, %v732_v45  ;;  %v738_v55 = vadd.s32 %v732_v45, %v728_v43  ;;  %v755_v63 = vshrl.u32 %v751_v38, 16  ;;  %v759_v23 = vsel %vm758_vm10, 1, %v2650_v21 }
  0xfb   : > { %v737_v59 = vsel %vm736_vm9, 1, %v2650_v21  ;;  %v761_v24 = vadd.s32 %v759_v23, %v753_v49  ;;  %vm762_vm12 = vc.u32 %v760_v60, %v756_v56  ;;  %v2925_v1 = vor.u32 %v850_v10, %v849_v37 }
  0xfc   : > { %v739_v62 = vadd.s32 %v737_v59, %v731_v44  ;;  %vm740_vm11 = vc.u32 %v738_v55, %v734_v48  ;;  %v763_v4 = vsel %vm762_vm12, 1, %v2650_v21  ;;  %v855_v9 = vshll.u32 %v2651_v12, %v2849_v15 }
  0xfd   : > { %v741_v0 = vsel %vm740_vm11, 1, %v2650_v21  ;;  %v856_v14 = vshrl.u32 %v2652_v16, %v2868_v26  ;;  %v765_v22 = vadd.s32 %v763_v4, %v761_v24  ;;  %v854_v34 = vor.u32 %v853_v61, %v852_v20 }
  0xfe   : > { %v743_v3 = vadd.s32 %v741_v0, %v739_v62  ;;  %v858_v35 = vshll.u32 %v2652_v16, %v2849_v15  ;;  %v859_v38 = vshrl.u32 %v2656_v39, %v2868_v26  ;;  %v757_v37 = vshrl.u32 %v752_v40, 16 }
  0xff   : > { %v2936_v10 = vadd.s32 %v760_v60, %v756_v56  ;;  %v857_v44 = vor.u32 %v856_v14, %v855_v9  ;;  %v766_v45 = vadd.s32 %v765_v22, %v755_v63  ;;  %vm861_vm13 = vcmp.lt.s32.totalorder %v2902_v30, 1 }
 0x100   : > { %v744_v43 = vadd.s32 %v743_v3, %v733_v47  ;;  %v860_v46 = vor.u32 %v859_v38, %v858_v35  ;;  %vm864_vm14 = vcmp.lt.s32.totalorder %v2902_v30, 4  ;;  %vm863_vm1 = vcmp.lt.s32.totalorder %v2902_v30, 3 }
 0x101   : > { %v869_v15 = vsel %vm861_vm13, %v2909_v36, %v2925_v1  ;;  %v870_v40 = vsel %vm864_vm14, %v857_v44, 920167782  ;;  %v767_v47 = vadd.s32 %v766_v45, %v757_v37  ;;  %vm862_vm2 = vcmp.lt.s32.totalorder %v2902_v30, 2 }
 0x102   : > { %v2941_v20 = vadd.s32 %v744_v43, %v735_v51  ;;  %v871_v48 = vsel %vm863_vm1, %v854_v34, %v870_v40  ;;  %v873_v49 = vsel %vm861_vm13, %v2925_v1, %v854_v34  ;;  %v397_v50 = vshrl.u32 %v2656_v39, %v2843_v11 }
 0x103   : > { %v872_v51 = vsel %vm862_vm2, %v869_v15, %v871_v48  ;;  %v874_v55 = vsel %vm864_vm14, %v860_v46, 1326507024  ;;  %v548_v56 = vshrl.u32 %v2652_v16, %v2856_v18  ;;  %v771_v59 = vadd.s32 1, %v767_v47 }
 0x104   : > { %vm770_vm3 = vc.u32 %v2941_v20, %v2936_v10  ;;  %v875_v60 = vsel %vm863_vm1, %v857_v44, %v874_v55  ;;  %v2970_v61 = vshll.u32 %v837_v33, 8  ;;  %v768_v62 = vmul.u32 %v2836_v6, %v2905_v32 }
 0x105   : > { %v876_v63 = vsel %vm862_vm2, %v873_v49, %v875_v60  ;;  %v902_v23 = vand.u32 65535, %v872_v51  ;;  %v903_v0 = vshrl.u32 %v872_v51, 16  ;;  %v2978_v24 = vor.u32 %v2900_v28, %v2847_v13 }
 0x106   : > { %v772_v3 = vsel %vm770_vm3, %v771_v59, %v767_v47  ;;  %v878_v4 = vand.u32 65535, %v2970_v61  ;;  %v880_v9 = vand.u32 65535, %v876_v63  ;;  %v2983_v58 = vshrl.u32 %v2656_v39, %v2856_v18 }
 0x107   : > { %v773_v33 = vadd.s32 %v772_v3, %v768_v62  ;;  %v879_v6 = vshrl.u32 %v2970_v61, 16  ;;  %v881_v32 = vshrl.u32 %v876_v63, 16  ;;  %v398_v14 = vor.u32 %v397_v50, %v2853_v17 }
 0x108   : > { %v2988_v22 = vor.u32 %v548_v56, %v2860_v19  ;;  %v845_v13 = vshrl.u32 %v2653_v27, %v2868_v26  ;;  %v905_v28 = vmul.u32 %v903_v0, %v878_v4  ;;  %v2995_v44 = vsel %vm402_vm15, %v2978_v24, 920167782 }
 0x109   : > { %v774_v35 = vadd.s32 536870912, %v773_v33  ;;  %v883_v38 = vmul.u32 %v881_v32, %v878_v4  ;;  %v884_v43 = vmul.u32 %v880_v9, %v879_v6  ;;  %v906_v37 = vmul.u32 %v902_v23, %v879_v6 }
 0x10a   : > { %v865_v17 = vsel %vm861_vm13, %v845_v13, %v2909_v36  ;;  %v904_v45 = vmul.u32 %v902_v23, %v878_v4  ;;  %v908_v19 = vshll.u32 %v905_v28, 16  ;;  %v866_v26 = vsel %vm864_vm14, %v854_v34, 2102212464 }
 0x10b   : > { %v3000_v46 = vshrl.u32 %v774_v35, 30  ;;  %v882_v15 = vmul.u32 %v880_v9, %v878_v4  ;;  %v886_v40 = vshll.u32 %v883_v38, 16  ;;  %v885_v47 = vmul.u32 %v881_v32, %v879_v6 }
 0x10c   : > { %v910_v48 = vshll.u32 %v906_v37, 16  ;;  %vm912_vm4 = vc.u32 %v904_v45, %v908_v19  ;;  %v914_v49 = vadd.s32 %v908_v19, %v904_v45  ;;  %v888_v51 = vshll.u32 %v884_v43, 16 }
 0x10d   : > { %v776_v50 = vshll.u32 %v3000_v46, 30  ;;  %vm890_vm5 = vc.u32 %v882_v15, %v886_v40  ;;  %v892_v55 = vadd.s32 %v886_v40, %v882_v15  ;;  %v907_v56 = vmul.u32 %v903_v0, %v879_v6 }
 0x10e   : > { %v891_v36 = vsel %vm890_vm5, 1, %v2650_v21  ;;  %v913_v59 = vsel %vm912_vm4, 1, %v2650_v21  ;;  %vm916_vm6 = vc.u32 %v914_v49, %v910_v48  ;;  %v867_v34 = vsel %vm863_vm1, %v2925_v1, %v866_v26 }
 0x10f   : > { %v777_v60 = vsub.s32 %v773_v33, %v776_v50  ;;  %v893_v62 = vadd.s32 %v891_v36, %v885_v47  ;;  %vm894_vm7 = vc.u32 %v892_v55, %v888_v51  ;;  %v915_v23 = vadd.s32 %v913_v59, %v907_v56 }
 0x110   : > { %v895_v63 = vsel %vm894_vm7, 1, %v2650_v21  ;;  %v917_v3 = vsel %vm916_vm6, 1, %v2650_v21  ;;  %v367_v4 = vand.u32 2147483647, %v2817_v41  ;;  %v412_v0 = vsel %vm402_vm15, %v398_v14, 1326507024 }
 0x111   : > { %vm778_vm8 = vcmp.lt.s32.totalorder %v777_v60, 0  ;;  %v779_v9 = vsub.s32 0, %v777_v60  ;;  %v897_v6 = vadd.s32 %v895_v63, %v893_v62  ;;  %v868_v33 = vsel %vm862_vm2, %v865_v17, %v867_v34 }
 0x112   : > { %v887_v32 = vshrl.u32 %v883_v38, 16  ;;  %v909_v1 = vshrl.u32 %v905_v28, 16  ;;  %v919_v13 = vadd.s32 %v917_v3, %v915_v23  ;;  %v769_v35 = vadd.s32 %v2936_v10, %v2941_v20 }
 0x113   : > { %v780_v45 = vsel %vm778_vm8, %v779_v9, %v777_v60  ;;  %v889_v19 = vshrl.u32 %v884_v43, 16  ;;  %v911_v26 = vshrl.u32 %v906_v37, 16  ;;  %vm677_vm9 = vcmp.lt.s32.totalorder %v2823_v52, 0 }
 0x114   : > { %v781_v15 = vclz %v780_v45  ;;  %v898_v40 = vadd.s32 %v897_v6, %v887_v32  ;;  %v920_v14 = vadd.s32 %v919_v13, %v909_v1  ;;  %v374_v47 = vand.u32 8388607, %v367_v4 }
 0x115   : > { %v384_v30 = vshll.u32 %v2653_v27, %v2832_v2  ;;  %v385_v28 = vshrl.u32 %v2654_v29, %v2843_v11  ;;  %v387_v10 = vshll.u32 %v2654_v29, %v2832_v2  ;;  %v388_v20 = vshrl.u32 %v2655_v31, %v2843_v11 }
 0x116   : > { %v2483_v38 = vadd.s32 4294967294, %v781_v15  ;;  %v3030_v43 = vadd.s32 %v898_v40, %v889_v19  ;;  %v3032_v37 = vadd.s32 %v914_v49, %v910_v48  ;;  %v921_v17 = vadd.s32 %v920_v14, %v911_v26 }
 0x117   : > { %v3034_v50 = vor.u32 %v385_v28, %v384_v30  ;;  %v3036_v51 = vor.u32 %v388_v20, %v387_v10  ;;  %v390_v55 = vshll.u32 %v2655_v31, %v2832_v2  ;;  %v391_v36 = vshrl.u32 %v2651_v12, %v2843_v11 }
 0x118   : > { %vm2484_vm10 = vcmp.lt.s32.totalorder %v2483_v38, 0  ;;  %v922_v56 = vmul.u32 %v2970_v61, %v868_v33  ;;  %vm924_vm11 = vc.u32 %v3030_v43, %v3032_v37  ;;  %v925_v59 = vadd.s32 1, %v921_v17 }
 0x119   : > { %v784_v48 = vsel %vm2484_vm10, 0, %v2483_v38  ;;  %v799_v49 = vsub.s32 4, %v3000_v46  ;;  %v375_v34 = vor.u32 8388608, %v374_v47  ;;  %v392_v62 = vor.u32 %v391_v36, %v390_v55 }
 0x11a   : > { %v785_v63 = vsub.s32 32, %v784_v48  ;;  %v789_v23 = vsub.s32 4294967266, %v784_v48  ;;  %v926_v3 = vsel %vm924_vm11, %v925_v59, %v921_v17  ;;  %vm399_vm12 = vcmp.lt.s32.totalorder %v2838_v7, 1 }
 0x11b   : > { %v927_v2 = vadd.s32 %v926_v3, %v922_v56  ;;  %vm400_vm13 = vcmp.lt.s32.totalorder %v2838_v7, 2  ;;  %vm401_vm14 = vcmp.lt.s32.totalorder %v2838_v7, 3  ;;  %v407_v61 = vsel %vm399_vm12, %v3034_v50, %v3036_v51 }
 0x11c   : > { %v786_v9 = vshll.u32 %v777_v60, %v784_v48  ;;  %v787_v6 = vshrl.u32 %v769_v35, %v785_v63  ;;  %v790_v33 = vadd.s32 127, %v789_v23  ;;  %v409_v32 = vsel %vm401_vm14, %v392_v62, %v2995_v44 }
 0x11d   : > { %v800_v1 = vsel %vm677_vm9, %v799_v49, %v3000_v46  ;;  %v928_v13 = vadd.s32 536870912, %v927_v2  ;;  %v3061_v45 = vsel %vm400_vm13, %v407_v61, %v409_v32  ;;  %v411_v19 = vsel %vm399_vm12, %v3036_v51, %v392_v62 }
 0x11e   : > { %v788_v60 = vor.u32 %v787_v6, %v786_v9  ;;  %v791_v35 = vshll.u32 %v790_v33, 23  ;;  %v413_v26 = vsel %vm401_vm14, %v2978_v24, %v412_v0  ;;  %v3069_v44 = vshll.u32 %v375_v34, 8 }
 0x11f   : > { %v552_v46 = vor.u32 %v2983_v58, %v2885_v54  ;;  %vm3075_vm1 = vcmp.le.f32.partialorder %v675_v57, 0.7853982  ;;  %v3079_v40 = vshrl.u32 %v928_v13, 30  ;;  %v414_v14 = vsel %vm400_vm13, %v411_v19, %v413_v26 }
 0x120   : > { %vm556_vm2 = vcmp.lt.s32.totalorder %v2840_v8, 4  ;;  %v792_v47 = vor.u32 4788187, %v791_v35  ;;  %v802_v24 = vsel %vm3075_vm1, 0, %v800_v1  ;;  %v441_v0 = vshrl.u32 %v3061_v45, 16 }
 0x121   : > { %v930_v54 = vshll.u32 %v3079_v40, 30  ;;  %v416_v57 = vand.u32 65535, %v3069_v44  ;;  %v418_v58 = vand.u32 65535, %v414_v14  ;;  %v419_v30 = vshrl.u32 %v414_v14, 16 }
 0x122   : > { %v3092_v28 = vsel %vm556_vm2, %v2988_v22, 920167782  ;;  %v793_v10 = vand.u32 2147483647, %v792_v47  ;;  %v795_v20 = vcvt.s32.f32 %v788_v60  ;;  %v417_v38 = vshrl.u32 %v3069_v44, 16 }
 0x123   : > { %v3097_v17 = vsel %vm556_vm2, %v552_v46, 1326507024  ;;  %v3099_v55 = vand.u32 3, %v802_v24  ;;  %v3101_v36 = vsub.s32 %v927_v2, %v930_v54  ;;  %v421_v56 = vmul.u32 %v419_v30, %v416_v57 }
 0x124   : > { %v796_v59 = vmul.f32 %v795_v20, %v793_v10  ;;  %v383_v48 = vshrl.u32 %v2653_v27, %v2843_v11  ;;  %v3105_v49 = vmul.u32 %v418_v58, %v417_v38  ;;  %v440_v34 = vand.u32 65535, %v3061_v45 }
 0x125   : > { %vm932_vm3 = vcmp.lt.s32.totalorder %v3101_v36, 0  ;;  %v933_v63 = vsub.s32 0, %v3101_v36  ;;  %v424_v23 = vshll.u32 %v421_v56, 16  ;;  %v3110_v3 = vmul.u32 %v441_v0, %v416_v57 }
 0x126   : > { %v797_v61 = vxor.u32 2147483648, %v796_v59  ;;  %v923_v2 = vadd.s32 %v3032_v37, %v3030_v43  ;;  %v3117_v9 = vsel %vm399_vm12, %v383_v48, %v3034_v50  ;;  %v420_v11 = vmul.u32 %v418_v58, %v416_v57 }
 0x127   : > { %v934_v6 = vsel %vm932_vm3, %v933_v63, %v3101_v36  ;;  %v404_v33 = vsel %vm402_vm15, %v392_v62, 2102212464  ;;  %v423_v32 = vmul.u32 %v419_v30, %v417_v38  ;;  %v426_v1 = vshll.u32 %v3105_v49, 16 }
 0x128   : > { %v798_v13 = vsel %vm677_vm9, %v797_v61, %v796_v59  ;;  %v935_v45 = vclz %v934_v6  ;;  %vm428_vm4 = vc.u32 %v420_v11, %v424_v23  ;;  %v430_v43 = vadd.s32 %v424_v23, %v420_v11 }
 0x129   : > { %v3128_v37 = vsel %vm3075_vm1, %v2823_v52, %v798_v13  ;;  %v429_v50 = vsel %vm428_vm4, 1, %v2650_v21  ;;  %v444_v19 = vmul.u32 %v440_v34, %v417_v38  ;;  %v446_v60 = vshll.u32 %v3110_v3, 16 }
 0x12a   : > { %v803_v62 = vmul.f32 %v3128_v37, %v3128_v37  ;;  %v2486_v35 = vadd.s32 4294967294, %v935_v45  ;;  %v431_v26 = vadd.s32 %v429_v50, %v423_v32  ;;  %vm432_vm15 = vc.u32 %v430_v43, %v426_v1 }
 0x12b   : > { %v405_v46 = vsel %vm401_vm14, %v3036_v51, %v404_v33  ;;  %v425_v14 = vshrl.u32 %v421_v56, 16  ;;  %v433_v15 = vsel %vm432_vm15, 1, %v2650_v21  ;;  %v442_v47 = vmul.u32 %v440_v34, %v416_v57 }
 0x12c   : > { %v804_v24 = vmul.f32 -0.001358992, %v803_v62  ;;  %v811_v54 = vmul.f32 -0.00019511016, %v803_v62  ;;  %vm2487_vm5 = vcmp.lt.s32.totalorder %v2486_v35, 0  ;;  %v435_v58 = vadd.s32 %v433_v15, %v431_v26 }
 0x12d   : > { %v938_v30 = vsel %vm2487_vm5, 0, %v2486_v35  ;;  %v448_v10 = vshll.u32 %v444_v19, 16  ;;  %vm450_vm6 = vc.u32 %v442_v47, %v446_v60  ;;  %v452_v20 = vadd.s32 %v446_v60, %v442_v47 }
 0x12e   : > { %v805_v59 = vadd.f32 0.041655596, %v804_v24  ;;  %v812_v48 = vadd.f32 0.008332121, %v811_v54  ;;  %vm831_vm7 = vcmp.lt.s32.totalorder %v2825_v53, 0  ;;  %v939_v63 = vsub.s32 32, %v938_v30 }
 0x12f   : > { %v445_v23 = vmul.u32 %v441_v0, %v417_v38  ;;  %v943_v61 = vsub.s32 4294967266, %v938_v30  ;;  %v436_v51 = vadd.s32 %v435_v58, %v425_v14  ;;  %v451_v56 = vsel %vm450_vm6, 1, %v2650_v21 }
 0x130   : > { %vm454_vm8 = vc.u32 %v452_v20, %v448_v10  ;;  %v806_v57 = vmul.f32 %v805_v59, %v803_v62  ;;  %v813_v34 = vmul.f32 %v812_v48, %v803_v62  ;;  %v941_v11 = vshrl.u32 %v923_v2, %v939_v63 }
 0x131   : > { %v453_v6 = vadd.s32 %v451_v56, %v445_v23  ;;  %v940_v33 = vshll.u32 %v3101_v36, %v938_v30  ;;  %v944_v32 = vadd.s32 127, %v943_v61  ;;  %v427_v1 = vshrl.u32 %v3105_v49, 16 }
 0x132   : > { %v455_v13 = vsel %vm454_vm8, 1, %v2650_v21  ;;  %v807_v45 = vadd.f32 -0.4999988, %v806_v57  ;;  %v814_v43 = vadd.f32 -0.16666654, %v813_v34  ;;  %v447_v0 = vshrl.u32 %v3110_v3, 16 }
 0x133   : > { %v457_v38 = vadd.s32 %v455_v13, %v453_v6  ;;  %vm821_vm9 = vcmp.eq.s32.totalorder %v3099_v55, 0  ;;  %v942_v50 = vor.u32 %v941_v11, %v940_v33  ;;  %v945_v60 = vshll.u32 %v944_v32, 23 }
 0x134   : > { %v953_v35 = vsub.s32 4, %v3079_v40  ;;  %v3146_v2 = vadd.s32 %v436_v51, %v427_v1  ;;  %v808_v26 = vmul.f32 %v807_v45, %v803_v62  ;;  %v815_v36 = vmul.f32 %v814_v43, %v803_v62 }
 0x135   : > { %vm820_vm10 = vcmp.lt.s32.totalorder %v3099_v55, 2  ;;  %v449_v49 = vshrl.u32 %v444_v19, 16  ;;  %v458_v14 = vadd.s32 %v457_v38, %v447_v0  ;;  %vm818_vm11 = vweird.f32 %v2823_v52 }
 0x136   : > { %vm824_vm12 = vcmp.eq.s32.totalorder %v3099_v55, 2  ;;  %vm3153_vm14 = vcmp.le.f32.partialorder %v829_v25, 0.7853982  ;;  %v946_v15 = vor.u32 4788187, %v945_v60  ;;  %v406_v47 = vsel %vm400_vm13, %v3117_v9, %v405_v46 }
 0x137   : > { %v3160_v62 = vadd.s32 %v452_v20, %v448_v10  ;;  %v809_v24 = vadd.f32 1.0, %v808_v26  ;;  %v816_v19 = vadd.f32 1.0, %v815_v36  ;;  %v459_v54 = vadd.s32 %v458_v14, %v449_v49 }
 0x138   : > { %v521_v58 = vand.u32 2147483647, %v2819_v42  ;;  %v947_v30 = vand.u32 2147483647, %v946_v15  ;;  %v949_v59 = vcvt.s32.f32 %v942_v50  ;;  %v954_v25 = vsel %vm831_vm7, %v953_v35, %v3079_v40 }
 0x139   : > { %vm462_vm1 = vc.u32 %v3146_v2, %v3160_v62  ;;  %v817_v48 = vmul.f32 %v816_v19, %v3128_v37  ;;  %v825_v7 = vxor.u32 2147483648, %v809_v24  ;;  %v463_v9 = vadd.s32 1, %v459_v54 }
 0x13a   : > { %v539_v46 = vshrl.u32 %v2654_v29, %v2856_v18  ;;  %v950_v10 = vmul.f32 %v949_v59, %v947_v30  ;;  %v460_v20 = vmul.u32 %v3069_v44, %v406_v47  ;;  %v538_v63 = vshll.u32 %v2653_v27, %v2834_v5 }
 0x13b   : > { %v542_v23 = vshrl.u32 %v2655_v31, %v2856_v18  ;;  %v822_v40 = vxor.u32 2147483648, %v817_v48  ;;  %v464_v61 = vsel %vm462_vm1, %v463_v9, %v459_v54  ;;  %v528_v51 = vand.u32 8388607, %v521_v58 }
 0x13c   : > { %v541_v37 = vshll.u32 %v2654_v29, %v2834_v5  ;;  %v951_v56 = vxor.u32 2147483648, %v950_v10  ;;  %v465_v57 = vadd.s32 %v464_v61, %v460_v20  ;;  %v544_v34 = vshll.u32 %v2655_v31, %v2834_v5 }
 0x13d   : > { %v545_v44 = vshrl.u32 %v2651_v12, %v2856_v18  ;;  %v823_v11 = vsel %vm821_vm9, %v809_v24, %v822_v40  ;;  %v826_v6 = vsel %vm824_vm12, %v825_v7, %v817_v48  ;;  %v3188_v33 = vor.u32 %v539_v46, %v538_v63 }
 0x13e   : > { %v3190_v32 = vor.u32 %v542_v23, %v541_v37  ;;  %v827_v1 = vsel %vm820_vm10, %v823_v11, %v826_v6  ;;  %v952_v13 = vsel %vm831_vm7, %v951_v56, %v950_v10  ;;  %v466_v5 = vadd.s32 536870912, %v465_v57 }
 0x13f   : > { %v3196_v45 = vor.u32 %v545_v44, %v544_v34  ;;  %v828_v43 = vsel %vm818_vm11, nan, %v827_v1  ;;  %v955_v0 = vsel %vm3153_vm14, %v2825_v53, %v952_v13  ;;  %v956_v38 = vsel %vm3153_vm14, 0, %v954_v25 }
 0x140   : > { %v529_v50 = vor.u32 8388608, %v528_v51  ;;  %1019 = vmatpush.msra.mxu2 %v828_v43  ;;  %v957_v55 = vmul.f32 %v955_v0, %v955_v0  ;;  %v3205_v60 = vshrl.u32 %v466_v5, 30  ;;  %vm553_vm13 = vcmp.lt.s32.totalorder %v2840_v8, 1 }
 0x141   : > { %vm555_vm3 = vcmp.lt.s32.totalorder %v2840_v8, 3  ;;  %vm554_vm4 = vcmp.lt.s32.totalorder %v2840_v8, 2  ;;  %v561_v52 = vsel %vm553_vm13, %v3188_v33, %v3190_v32  ;;  %v565_v35 = vsel %vm553_vm13, %v3190_v32, %v3196_v45 }
 0x142   : > { %v567_v26 = vsel %vm555_vm3, %v2988_v22, %v3097_v17  ;;  %v958_v36 = vmul.f32 -0.001358992, %v957_v55  ;;  %v965_v49 = vmul.f32 -0.00019511016, %v957_v55  ;;  %v468_v14 = vshll.u32 %v3205_v60, 30 }
 0x143   : > { %v563_v3 = vsel %vm555_vm3, %v3196_v45, %v3092_v28  ;;  %v568_v15 = vsel %vm554_vm4, %v565_v35, %v567_v26  ;;  %v3229_v47 = vshll.u32 %v529_v50, 8  ;;  %v973_v30 = vand.u32 3, %v956_v38 }
 0x144   : > { %v959_v24 = vadd.f32 0.041655596, %v958_v36  ;;  %v966_v19 = vadd.f32 0.008332121, %v965_v49  ;;  %v469_v54 = vsub.s32 %v465_v57, %v468_v14  ;;  %v564_v22 = vsel %vm554_vm4, %v561_v52, %v563_v3 }
 0x145   : > { %v571_v17 = vshrl.u32 %v3229_v47, 16  ;;  %v572_v59 = vand.u32 65535, %v568_v15  ;;  %v570_v28 = vand.u32 65535, %v3229_v47  ;;  %v573_v9 = vshrl.u32 %v568_v15, 16 }
 0x146   : > { %v960_v25 = vmul.f32 %v959_v24, %v957_v55  ;;  %v967_v48 = vmul.f32 %v966_v19, %v957_v55  ;;  %vm470_vm15 = vcmp.lt.s32.totalorder %v469_v54, 0  ;;  %v471_v7 = vsub.s32 0, %v469_v54 }
 0x147   : > { %v3235_v63 = vmul.u32 %v572_v59, %v571_v17  ;;  %vm975_vm5 = vcmp.eq.s32.totalorder %v973_v30, 0  ;;  %v594_v40 = vand.u32 65535, %v564_v22  ;;  %v595_v61 = vshrl.u32 %v564_v22, 16 }
 0x148   : > { %v961_v46 = vadd.f32 -0.4999988, %v960_v25  ;;  %v968_v10 = vadd.f32 -0.16666654, %v967_v48  ;;  %v472_v20 = vsel %vm470_vm15, %v471_v7, %v469_v54  ;;  %vm974_vm6 = vcmp.lt.s32.totalorder %v973_v30, 2 }
 0x149   : > { %v473_v23 = vclz %v472_v20  ;;  %vm978_vm7 = vcmp.eq.s32.totalorder %v973_v30, 2  ;;  %v575_v56 = vmul.u32 %v573_v9, %v570_v28  ;;  %vm972_vm8 = vweird.f32 %v2825_v53 }
 0x14a   : > { %v962_v51 = vmul.f32 %v961_v46, %v957_v55  ;;  %v969_v37 = vmul.f32 %v968_v10, %v957_v55  ;;  %v461_v57 = vadd.s32 %v3160_v62, %v3146_v2  ;;  %v574_v44 = vmul.u32 %v572_v59, %v570_v28 }
 0x14b   : > { %v2477_v34 = vadd.s32 4294967294, %v473_v23  ;;  %v577_v11 = vmul.u32 %v573_v9, %v571_v17  ;;  %v578_v13 = vshll.u32 %v575_v56, 16  ;;  %v580_v5 = vshll.u32 %v3235_v63, 16 }
 0x14c   : > { %v963_v6 = vadd.f32 1.0, %v962_v51  ;;  %v970_v1 = vadd.f32 1.0, %v969_v37  ;;  %v596_v43 = vmul.u32 %v594_v40, %v570_v28  ;;  %v597_v38 = vmul.u32 %v595_v61, %v570_v28 }
 0x14d   : > { %vm2478_vm9 = vcmp.lt.s32.totalorder %v2477_v34, 0  ;;  %v598_v50 = vmul.u32 %v594_v40, %v571_v17  ;;  %vm582_vm10 = vc.u32 %v574_v44, %v578_v13  ;;  %v579_v49 = vshrl.u32 %v575_v56, 16 }
 0x14e   : > { %v971_v55 = vmul.f32 %v970_v1, %v955_v0  ;;  %v979_v52 = vxor.u32 2147483648, %v963_v6  ;;  %v476_v35 = vsel %vm2478_vm9, 0, %v2477_v34  ;;  %v583_v2 = vsel %vm582_vm10, 1, %v2650_v21 }
 0x14f   : > { %v477_v26 = vsub.s32 32, %v476_v35  ;;  %v481_v36 = vsub.s32 4294967266, %v476_v35  ;;  %v584_v14 = vadd.s32 %v578_v13, %v574_v44  ;;  %v585_v3 = vadd.s32 %v583_v2, %v577_v11 }
 0x150   : > { %v976_v62 = vxor.u32 2147483648, %v971_v55  ;;  %v599_v15 = vmul.u32 %v595_v61, %v571_v17  ;;  %v478_v24 = vshll.u32 %v469_v54, %v476_v35  ;;  %v600_v59 = vshll.u32 %v597_v38, 16 }
 0x151   : > { %v479_v19 = vshrl.u32 %v461_v57, %v477_v26  ;;  %v482_v22 = vadd.s32 127, %v481_v36  ;;  %v980_v0 = vsel %vm978_vm7, %v979_v52, %v971_v55  ;;  %vm586_vm11 = vc.u32 %v584_v14, %v580_v5 }
 0x152   : > { %v977_v25 = vsel %vm975_vm5, %v963_v6, %v976_v62  ;;  %v602_v48 = vshll.u32 %v598_v50, 16  ;;  %v587_v46 = vsel %vm586_vm11, 1, %v2650_v21  ;;  %vm604_vm12 = vc.u32 %v596_v43, %v600_v59 }
 0x153   : > { %v981_v7 = vsel %vm974_vm6, %v977_v25, %v980_v0  ;;  %v480_v28 = vor.u32 %v479_v19, %v478_v24  ;;  %v483_v9 = vshll.u32 %v482_v22, 23  ;;  %v589_v17 = vadd.s32 %v587_v46, %v585_v3 }
 0x154   : > { %v982_v10 = vsel %vm972_vm8, nan, %v981_v7  ;;  %v606_v54 = vadd.s32 %v600_v59, %v596_v43  ;;  %v537_v23 = vshrl.u32 %v2653_v27, %v2856_v18  ;;  %v605_v40 = vsel %vm604_vm12, 1, %v2650_v21 }
 0x155   : > { %1042 = vmatpush.msra.mxu3 %v982_v10  ;;  %v484_v20 = vor.u32 4788187, %v483_v9  ;;  %v558_v30 = vsel %vm556_vm2, %v3196_v45, 2102212464  ;;  %v590_v61 = vadd.s32 %v589_v17, %v579_v49  ;;  %v607_v51 = vadd.s32 %v605_v40, %v599_v15 }
 0x156   : > { %vm608_vm14 = vc.u32 %v606_v54, %v602_v48  ;;  %v487_v53 = vcvt.s32.f32 %v480_v28  ;;  %v581_v56 = vshrl.u32 %v3235_v63, 16  ;;  %v601_v34 = vshrl.u32 %v597_v38, 16 }
 0x157   : > { %v485_v37 = vand.u32 2147483647, %v484_v20  ;;  %v609_v57 = vsel %vm608_vm14, 1, %v2650_v21  ;;  %v557_v18 = vsel %vm553_vm13, %v537_v23, %v3188_v33  ;;  %v559_v45 = vsel %vm555_vm3, %v3190_v32, %v558_v30 }
 0x158   : > { %v611_v44 = vadd.s32 %v609_v57, %v607_v51  ;;  %v591_v6 = vadd.s32 %v590_v61, %v581_v56  ;;  %v603_v1 = vshrl.u32 %v598_v50, 16  ;;  %v610_v43 = vadd.s32 %v606_v54, %v602_v48 }
 0x159   : > { %v488_v11 = vmul.f32 %v487_v53, %v485_v37  ;;  %vm369_vm2 = vcmp.lt.s32.totalorder %v2817_v41, 0  ;;  %v560_v63 = vsel %vm554_vm4, %v557_v18, %v559_v45  ;;  %vm3267_vm1 = vcmp.le.f32.partialorder %v367_v4, 0.7853982 }
 0x15a   : > { %v612_v13 = vadd.s32 %v611_v44, %v601_v34  ;;  %vm616_vm13 = vc.u32 %v591_v6, %v610_v43  ;;  %v614_v8 = vmul.u32 %v3229_v47, %v560_v63  ;;  %v491_v4 = vsub.s32 4, %v3205_v60 }
 0x15b   : > { %v489_v5 = vxor.u32 2147483648, %v488_v11  ;;  %vm510_vm6 = vweird.f32 %v2817_v41  ;;  %v615_v56 = vadd.s32 %v610_v43, %v591_v6  ;;  %v2489_v6 = vld [vmem:[%s4252_s1 + $0x18] sm:$0xff]  ;;  %vm523_vm8 = vcmp.lt.s32.totalorder %v2819_v42, 0 }
 0x15c   : > { %v613_v38 = vadd.s32 %v612_v13, %v603_v1  ;;  %v492_v19 = vsel %vm369_vm2, %v491_v4, %v3205_v60  ;;  %v2488_v13 = vld [vmem:[%s4252_s1 + $0x10] sm:$0xff]  ;;  %vm3297_vm9 = vcmp.le.f32.partialorder %v521_v58, 0.7853982  ;;  %vm664_vm14 = vweird.f32 %v2819_v42 }
 0x15d   : > { %v490_v33 = vsel %vm369_vm2, %v489_v5, %v488_v11  ;;  %v494_v25 = vsel %vm3267_vm1, 0, %v492_v19 }
 0x15e   : > { %v493_v32 = vsel %vm3267_vm1, %v2817_v41, %v490_v33  ;;  %v617_v50 = vadd.s32 1, %v613_v38  ;;  %v511_v10 = vand.u32 3, %v494_v25 }
 0x15f   : > { %v495_v52 = vmul.f32 %v493_v32, %v493_v32 }
 0x160   : > { %v618_v35 = vsel %vm616_vm13, %v617_v50, %v613_v38  ;;  %vm513_vm4 = vcmp.eq.s32.totalorder %v511_v10, 0  ;;  %vm516_vm15 = vcmp.eq.s32.totalorder %v511_v10, 2  ;;  %vm512_vm5 = vcmp.lt.s32.totalorder %v511_v10, 2 }
 0x161   : > { %v496_v26 = vmul.f32 -0.001358992, %v495_v52  ;;  %v503_v36 = vmul.f32 -0.00019511016, %v495_v52  ;;  %v619_v49 = vadd.s32 %v618_v35, %v614_v8 }
 0x163   : > { %v497_v2 = vadd.f32 0.041655596, %v496_v26  ;;  %v504_v62 = vadd.f32 0.008332121, %v503_v36  ;;  %v620_v14 = vadd.s32 536870912, %v619_v49 }
 0x165   : > { %v498_v3 = vmul.f32 %v497_v2, %v495_v52  ;;  %v505_v15 = vmul.f32 %v504_v62, %v495_v52  ;;  %v3278_v24 = vshrl.u32 %v620_v14, 30 }
 0x167   : > { %v499_v22 = vadd.f32 -0.4999988, %v498_v3  ;;  %v506_v59 = vadd.f32 -0.16666654, %v505_v15  ;;  %v622_v47 = vshll.u32 %v3278_v24, 30  ;;  %v645_v35 = vsub.s32 4, %v3278_v24 }
 0x169   : > { %v500_v0 = vmul.f32 %v499_v22, %v495_v52  ;;  %v507_v48 = vmul.f32 %v506_v59, %v495_v52  ;;  %v623_v7 = vsub.s32 %v619_v49, %v622_v47  ;;  %v2490_v49 = vld [vmem:[%s4253_s2 + $0x10] sm:$0xff]  ;;  %v646_v62 = vsel %vm523_vm8, %v645_v35, %v3278_v24 }
 0x16a   : > { %v648_v15 = vsel %vm3297_vm9, 0, %v646_v62 }
 0x16b   : > { %v501_v28 = vadd.f32 1.0, %v500_v0  ;;  %v508_v9 = vadd.f32 1.0, %v507_v48  ;;  %vm624_vm3 = vcmp.lt.s32.totalorder %v623_v7, 0  ;;  %v625_v46 = vsub.s32 0, %v623_v7 }
 0x16c   : > { %v665_v25 = vand.u32 3, %v648_v15 }
 0x16d   : > { %v509_v17 = vmul.f32 %v508_v9, %v493_v32  ;;  %v517_v54 = vxor.u32 2147483648, %v501_v28  ;;  %v626_v20 = vsel %vm624_vm3, %v625_v46, %v623_v7  ;;  %v2491_v32 = vld [vmem:[%s4253_s2 + $0x18] sm:$0xff] }
 0x16e   : > { %v627_v23 = vclz %v626_v20  ;;  %996 = vperm.xlu1 %2584, %v2491_v32   ;;  %vm667_vm10 = vcmp.eq.s32.totalorder %v665_v25, 0  ;;  %vm670_vm11 = vcmp.eq.s32.totalorder %v665_v25, 2  ;;  %vm666_vm12 = vcmp.lt.s32.totalorder %v665_v25, 2 }
 0x16f   : > { %v514_v60 = vxor.u32 2147483648, %v509_v17  ;;  %v518_v61 = vsel %vm516_vm15, %v517_v54, %v509_v17 }
 0x170   : > { %v2480_v40 = vadd.s32 4294967294, %v627_v23 }
 0x171   : > { %v515_v30 = vsel %vm513_vm4, %v501_v28, %v514_v60 }
 0x172   : > { %v519_v51 = vsel %vm512_vm5, %v515_v30, %v518_v61  ;;  %vm2481_vm7 = vcmp.lt.s32.totalorder %v2480_v40, 0 }
 0x173   : > { %v520_v37 = vsel %vm510_vm6, nan, %v519_v51  ;;  %v630_v53 = vsel %vm2481_vm7, 0, %v2480_v40 }
 0x174   : > { %1020 = vmatpush.msra.mxu2 %v520_v37  ;;  %v631_v57 = vsub.s32 32, %v630_v53  ;;  %v635_v34 = vsub.s32 4294967266, %v630_v53  ;;  %v632_v44 = vshll.u32 %v623_v7, %v630_v53 }
 0x175   : > { %2492 = vmatmul.msk.f32.vlgmr.msra.gmra.mxu2 %vm218_vm0, %v2488_v13 }
 0x176   : > { %v633_v11 = vshrl.u32 %v615_v56, %v631_v57  ;;  %v636_v18 = vadd.s32 127, %v635_v34  ;;  %991 = vperm.xlu1 %2584, %v2490_v49  }
 0x178   : > { %v634_v45 = vor.u32 %v633_v11, %v632_v44  ;;  %v637_v1 = vshll.u32 %v636_v18, 23 }
 0x17a   : > { %v638_v5 = vor.u32 4788187, %v637_v1  ;;  %v641_v63 = vcvt.s32.f32 %v634_v45 }
 0x17c   : > { %v639_v41 = vand.u32 2147483647, %v638_v5 }
 0x17d   : > { %2493 = vmatmul.msk.f32.gmra.mxu2 %vm218_vm0, %v2489_v6 }
 0x17e   : > { %v642_v38 = vmul.f32 %v641_v63, %v639_v41 }
 0x180   : > { %v643_v43 = vxor.u32 2147483648, %v642_v38 }
 0x182   : > { %v644_v33 = vsel %vm523_vm8, %v643_v43, %v642_v38 }
 0x183   : > { %v647_v50 = vsel %vm3297_vm9, %v2819_v42, %v644_v33 }
 0x184   : > { %v649_v52 = vmul.f32 %v647_v50, %v647_v50 }
 0x186   : > { %v650_v8 = vmul.f32 -0.001358992, %v649_v52  ;;  %v657_v58 = vmul.f32 -0.00019511016, %v649_v52 }
 0x188   : > { %v651_v26 = vadd.f32 0.041655596, %v650_v8  ;;  %v658_v36 = vadd.f32 0.008332121, %v657_v58 }
 0x18a   : > { %v652_v4 = vmul.f32 %v651_v26, %v649_v52  ;;  %v659_v2 = vmul.f32 %v658_v36, %v649_v52 }
 0x18c   : > { %v653_v14 = vadd.f32 -0.4999988, %v652_v4  ;;  %v660_v3 = vadd.f32 -0.16666654, %v659_v2 }
 0x18e   : > { %v654_v19 = vmul.f32 %v653_v14, %v649_v52  ;;  %v661_v22 = vmul.f32 %v660_v3, %v649_v52 }
 0x190   : > { %v655_v59 = vadd.f32 1.0, %v654_v19  ;;  %v662_v47 = vadd.f32 1.0, %v661_v22 }
 0x192   : > { %v663_v0 = vmul.f32 %v662_v47, %v647_v50  ;;  %v671_v48 = vxor.u32 2147483648, %v655_v59 }
 0x194   : > { %v668_v7 = vxor.u32 2147483648, %v663_v0  ;;  %v672_v9 = vsel %vm670_vm11, %v671_v48, %v663_v0 }
 0x196   : > { %v669_v28 = vsel %vm667_vm10, %v655_v59, %v668_v7 }
 0x197   : > { %v673_v24 = vsel %vm666_vm12, %v669_v28, %v672_v9 }
 0x198   : > { %v674_v46 = vsel %vm664_vm14, nan, %v673_v24 }
 0x199   : > { %1043 = vmatpush.msra.mxu3 %v674_v46 }
 0x19a   : > { %2494 = vmatmul.msk.f32.vlgmr.msra.gmra.mxu3 %vm218_vm0, %v2488_v13 }
 0x1a2   : > { %2495 = vmatmul.msk.f32.gmra.mxu3 %vm218_vm0, %v2489_v6 }
 0x1e0   : > { %v997_v10 = vpop.permute.xlu1 %996 }
 0x1e8   : > { %v992_v17 = vpop.permute.xlu1 %991 }
 0x1f8   : > { %v1022_v54 = vpop.f32.mrf.mxu2 }
 0x1f9   : > { %v3322_v20 = vadd.f32 %v1022_v54, %v992_v17 }
 0x1fb   : > { %v1054_v23 = vand.u32 2139095040, %v3322_v20 }
 0x1fd   : > { %v1055_v60 = vshrl.u32 %v1054_v23, 23 }
 0x1ff   : > { %v2496_v61 = vadd.s32 4294967169, %v1055_v60 }
 0x200   : > { %v1025_v40 = vpop.f32.mrf.mxu2 }
 0x201   : > { %v3325_v30 = vadd.f32 %v1025_v40, %v997_v10  ;;  %v1061_v53 = vadd.s32 1, %v2496_v61 }
 0x203   : > { %v1362_v42 = vand.u32 2139095040, %v3325_v30  ;;  %vm1062_vm1 = vcmp.gt.s32.totalorder %v1061_v53, 0  ;;  %v1359_v11 = vand.u32 2147483647, %v3325_v30 }
 0x204   : > { %v1063_v1 = vsel %vm1062_vm1, %v1061_v53, 0 }
 0x205   : > { %v1363_v51 = vshrl.u32 %v1362_v42, 23  ;;  %v1366_v6 = vand.u32 8388607, %v1359_v11  ;;  %v3349_v3 = vand.u32 31, %v1063_v1  ;;  %v3371_v46 = vshrl.u32 %v1063_v1, 5 }
 0x207   : > { %v2502_v37 = vadd.s32 4294967169, %v1363_v51  ;;  %v1367_v19 = vor.u32 8388608, %v1366_v6  ;;  %v3365_v28 = vsub.s32 32, %v3349_v3  ;;  %v3385_v51 = vshll.u32 %v2652_v16, %v3349_v3 }
 0x208   : > { %vm1086_vm9 = vcmp.lt.s32.totalorder %v3371_v46, 4 }
 0x209   : > { %v1369_v56 = vadd.s32 1, %v2502_v37  ;;  %v3369_v24 = vshll.u32 %v1367_v19, 8  ;;  %v1078_v61 = vshrl.u32 %v2652_v16, %v3365_v28 }
 0x20b   : > { %vm1370_vm2 = vcmp.gt.s32.totalorder %v1369_v56, 0  ;;  %v1408_v60 = vand.u32 65535, %v3369_v24  ;;  %v1409_v53 = vshrl.u32 %v3369_v24, 16 }
 0x20c   : > { %v1371_v44 = vsel %vm1370_vm2, %v1369_v56, 0  ;;  %v3390_v56 = vshrl.u32 %v2656_v39, %v3365_v28 }
 0x20d   : > { %v1373_v18 = vand.u32 31, %v1371_v44  ;;  %v3332_v13 = vshrl.u32 %v1371_v44, 5 }
 0x20f   : > { %v1374_v5 = vsub.s32 32, %v1373_v18  ;;  %v1385_v63 = vshll.u32 %v2651_v12, %v1373_v18  ;;  %v1388_v38 = vshll.u32 %v2652_v16, %v1373_v18  ;;  %v1376_v33 = vshll.u32 %v2653_v27, %v1373_v18 }
 0x210   : > { %v1379_v50 = vshll.u32 %v2654_v29, %v1373_v18  ;;  %v1382_v8 = vshll.u32 %v2655_v31, %v1373_v18  ;;  %vm1394_vm13 = vcmp.lt.s32.totalorder %v3332_v13, 4  ;;  %vm1391_vm3 = vcmp.lt.s32.totalorder %v3332_v13, 1 }
 0x211   : > { %v1386_v43 = vshrl.u32 %v2652_v16, %v1374_v5  ;;  %v1389_v55 = vshrl.u32 %v2656_v39, %v1374_v5  ;;  %v1377_v32 = vshrl.u32 %v2654_v29, %v1374_v5  ;;  %v1380_v52 = vshrl.u32 %v2655_v31, %v1374_v5 }
 0x212   : > { %v1383_v58 = vshrl.u32 %v2651_v12, %v1374_v5  ;;  %vm1393_vm4 = vcmp.lt.s32.totalorder %v3332_v13, 3  ;;  %vm1392_vm15 = vcmp.lt.s32.totalorder %v3332_v13, 2  ;;  %v1375_v1 = vshrl.u32 %v2653_v27, %v1374_v5 }
 0x213   : > { %v1387_v26 = vor.u32 %v1386_v43, %v1385_v63  ;;  %v1390_v36 = vor.u32 %v1389_v55, %v1388_v38  ;;  %v1378_v2 = vor.u32 %v1377_v32, %v1376_v33  ;;  %v1381_v62 = vor.u32 %v1380_v52, %v1379_v50 }
 0x214   : > { %v1384_v14 = vor.u32 %v1383_v58, %v1382_v8  ;;  %v1082_v5 = vor.u32 %v3390_v56, %v3385_v51 }
 0x215   : > { %v1400_v15 = vsel %vm1394_vm13, %v1387_v26, 920167782  ;;  %v1404_v22 = vsel %vm1394_vm13, %v1390_v36, 1326507024  ;;  %v1399_v0 = vsel %vm1391_vm3, %v1378_v2, %v1381_v62  ;;  %v1395_v32 = vsel %vm1391_vm3, %v1375_v1, %v1378_v2 }
 0x216   : > { %v1401_v48 = vsel %vm1393_vm4, %v1384_v14, %v1400_v15  ;;  %v1403_v7 = vsel %vm1391_vm3, %v1381_v62, %v1384_v14  ;;  %v1405_v9 = vsel %vm1393_vm4, %v1387_v26, %v1404_v22 }
 0x217   : > { %v1402_v54 = vsel %vm1392_vm15, %v1399_v0, %v1401_v48  ;;  %v1406_v23 = vsel %vm1392_vm15, %v1403_v7, %v1405_v9 }
 0x218   : > { %v1410_v40 = vand.u32 65535, %v1406_v23  ;;  %v1411_v42 = vshrl.u32 %v1406_v23, 16  ;;  %v1433_v18 = vshrl.u32 %v1402_v54, 16  ;;  %v1432_v43 = vand.u32 65535, %v1402_v54 }
 0x21a   : > { %v1413_v44 = vmul.u32 %v1411_v42, %v1408_v60  ;;  %v1412_v38 = vmul.u32 %v1410_v40, %v1408_v60  ;;  %v1435_v58 = vmul.u32 %v1433_v18, %v1408_v60  ;;  %v1415_v36 = vmul.u32 %v1411_v42, %v1409_v53 }
 0x21b   : > { %v1434_v22 = vmul.u32 %v1432_v43, %v1408_v60  ;;  %v1437_v7 = vmul.u32 %v1433_v18, %v1409_v53 }
 0x21c   : > { %v1416_v6 = vshll.u32 %v1413_v44, 16  ;;  %v1438_v0 = vshll.u32 %v1435_v58, 16 }
 0x21d   : > { %v1045_v57 = vpop.f32.mrf.mxu3 }
 0x21e   : > { %v3328_v34 = vadd.f32 %v1045_v57, %v992_v17  ;;  %v1396_v57 = vsel %vm1394_vm13, %v1384_v14, 2102212464  ;;  %vm1420_vm7 = vc.u32 %v1412_v38, %v1416_v6  ;;  %v1422_v8 = vadd.s32 %v1416_v6, %v1412_v38 }
 0x21f   : > { %v1397_v50 = vsel %vm1393_vm4, %v1381_v62, %v1396_v57  ;;  %v1421_v2 = vsel %vm1420_vm7, 1, %v2650_v21  ;;  %v1436_v62 = vmul.u32 %v1432_v43, %v1409_v53  ;;  %vm1442_vm10 = vc.u32 %v1434_v22, %v1438_v0 }
 0x220   : > { %v1208_v45 = vand.u32 2139095040, %v3328_v34  ;;  %v1423_v15 = vadd.s32 %v1421_v2, %v1415_v36  ;;  %v1443_v42 = vsel %vm1442_vm10, 1, %v2650_v21  ;;  %vm1361_vm7 = vcmp.lt.s32.totalorder %v3325_v30, 0 }
 0x221   : > { %v1440_v9 = vshll.u32 %v1436_v62, 16  ;;  %v1441_v57 = vshrl.u32 %v1436_v62, 16 }
 0x222   : > { %v1209_v41 = vshrl.u32 %v1208_v45, 23 }
 0x224   : > { %v2499_v35 = vadd.s32 4294967169, %v1209_v41  ;;  %v1414_v41 = vmul.u32 %v1410_v40, %v1409_v53 }
 0x225   : > { %v1048_v49 = vpop.f32.mrf.mxu3 }
 0x226   : > { %v3347_v4 = vadd.f32 %v1048_v49, %v997_v10  ;;  %v1215_v47 = vadd.s32 1, %v2499_v35  ;;  %v1077_v10 = vshll.u32 %v2651_v12, %v3349_v3  ;;  %v1418_v52 = vshll.u32 %v1414_v41, 16 }
 0x227   : > { %v3412_v49 = vsel %vm1392_vm15, %v1395_v32, %v1397_v50  ;;  %v1419_v60 = vshrl.u32 %v1414_v41, 16 }
 0x228   : > { %v1516_v59 = vand.u32 2139095040, %v3347_v4  ;;  %vm1216_vm5 = vcmp.gt.s32.totalorder %v1215_v47, 0  ;;  %v3397_v55 = vor.u32 %v1078_v61, %v1077_v10  ;;  %vm1424_vm8 = vc.u32 %v1422_v8, %v1418_v52 }
 0x229   : > { %v3394_v45 = vsel %vm1216_vm5, %v1215_v47, 0  ;;  %v1425_v19 = vsel %vm1424_vm8, 1, %v2650_v21  ;;  %v1513_v54 = vand.u32 2147483647, %v3347_v4  ;;  %v1439_v61 = vshrl.u32 %v1435_v58, 16 }
 0x22a   : > { %v1517_v25 = vshrl.u32 %v1516_v59, 23  ;;  %v3406_v35 = vand.u32 31, %v3394_v45  ;;  %v1427_v48 = vadd.s32 %v1425_v19, %v1423_v15 }
 0x22b   : > { %v1520_v18 = vand.u32 8388607, %v1513_v54 }
 0x22c   : > { %v2505_v17 = vadd.s32 4294967169, %v1517_v25  ;;  %v1417_v25 = vshrl.u32 %v1413_v44, 16 }
 0x22d   : > { %v1521_v43 = vor.u32 8388608, %v1520_v18  ;;  %v1051_v18 = vand.u32 2147483647, %v3322_v20 }
 0x22e   : > { %v1523_v37 = vadd.s32 1, %v2505_v17  ;;  %v1444_v17 = vadd.s32 %v1438_v0, %v1434_v22  ;;  %v1428_v40 = vadd.s32 %v1427_v48, %v1417_v25 }
 0x22f   : > { %v3454_v22 = vshll.u32 %v1521_v43, 8 }
 0x230   : > { %vm1524_vm6 = vcmp.gt.s32.totalorder %v1523_v37, 0  ;;  %vm1446_vm12 = vc.u32 %v1444_v17, %v1440_v9  ;;  %v3436_v6 = vadd.s32 %v1428_v40, %v1419_v60  ;;  %v3448_v62 = vadd.s32 %v1444_v17, %v1440_v9 }
 0x231   : > { %v1525_v63 = vsel %vm1524_vm6, %v1523_v37, 0  ;;  %v1445_v37 = vadd.s32 %v1443_v42, %v1437_v7  ;;  %v1447_v44 = vsel %vm1446_vm12, 1, %v2650_v21  ;;  %v3476_v7 = vsub.s32 32, %v3406_v35 }
 0x232   : > { %v1527_v33 = vand.u32 31, %v1525_v63  ;;  %v3418_v59 = vshrl.u32 %v1525_v63, 5  ;;  %vm1454_vm1 = vc.u32 %v3436_v6, %v3448_v62  ;;  %v1452_v9 = vmul.u32 %v3369_v24, %v3412_v49 }
 0x233   : > { %v1449_v63 = vadd.s32 %v1447_v44, %v1445_v37  ;;  %v1562_v60 = vand.u32 65535, %v3454_v22  ;;  %v1563_v40 = vshrl.u32 %v3454_v22, 16  ;;  %v3491_v24 = vsel %vm1086_vm9, %v1082_v5, 1326507024 }
 0x234   : > { %v3408_v26 = vsub.s32 32, %v1527_v33  ;;  %v1542_v47 = vshll.u32 %v2652_v16, %v1527_v33  ;;  %v1539_v23 = vshll.u32 %v2651_v12, %v1527_v33  ;;  %vm1548_vm11 = vcmp.lt.s32.totalorder %v3418_v59, 4 }
 0x235   : > { %v1530_v41 = vshll.u32 %v2653_v27, %v1527_v33  ;;  %v1533_v32 = vshll.u32 %v2654_v29, %v1527_v33  ;;  %v1450_v52 = vadd.s32 %v1449_v63, %v1439_v61  ;;  %v1536_v58 = vshll.u32 %v2655_v31, %v1527_v33 }
 0x236   : > { %v1543_v14 = vshrl.u32 %v2656_v39, %v3408_v26  ;;  %v1540_v13 = vshrl.u32 %v2652_v16, %v3408_v26  ;;  %v1531_v38 = vshrl.u32 %v2654_v29, %v3408_v26  ;;  %v1534_v50 = vshrl.u32 %v2655_v31, %v3408_v26 }
 0x237   : > { %v1537_v36 = vshrl.u32 %v2651_v12, %v3408_v26  ;;  %vm1545_vm14 = vcmp.lt.s32.totalorder %v3418_v59, 1  ;;  %v1451_v15 = vadd.s32 %v1450_v52, %v1441_v57  ;;  %vm1547_vm2 = vcmp.lt.s32.totalorder %v3418_v59, 3 }
 0x238   : > { %v1544_v10 = vor.u32 %v1543_v14, %v1542_v47  ;;  %v1541_v53 = vor.u32 %v1540_v13, %v1539_v23  ;;  %v3441_v8 = vor.u32 %v1531_v38, %v1530_v41  ;;  %v3450_v14 = vor.u32 %v1534_v50, %v1533_v32 }
 0x239   : > { %v1538_v19 = vor.u32 %v1537_v36, %v1536_v58  ;;  %v3459_v33 = vsel %vm1086_vm9, %v3397_v55, 920167782  ;;  %v1455_v0 = vadd.s32 1, %v1451_v15  ;;  %vm1546_vm13 = vcmp.lt.s32.totalorder %v3418_v59, 2 }
 0x23a   : > { %v1558_v1 = vsel %vm1548_vm11, %v1544_v10, 1326507024  ;;  %v1554_v2 = vsel %vm1548_vm11, %v1541_v53, 920167782  ;;  %v1553_v47 = vsel %vm1545_vm14, %v3441_v8, %v3450_v14  ;;  %v3494_v49 = vshrl.u32 %v3394_v45, 5 }
 0x23b   : > { %v1559_v25 = vsel %vm1547_vm2, %v1541_v53, %v1558_v1  ;;  %v1555_v13 = vsel %vm1547_vm2, %v1538_v19, %v1554_v2  ;;  %v1557_v48 = vsel %vm1545_vm14, %v3450_v14, %v1538_v19  ;;  %v1456_v23 = vsel %vm1454_vm1, %v1455_v0, %v1451_v15 }
 0x23c   : > { %v1556_v10 = vsel %vm1546_vm13, %v1553_v47, %v1555_v13  ;;  %v1560_v17 = vsel %vm1546_vm13, %v1557_v48, %v1559_v25  ;;  %v1457_v61 = vadd.s32 %v1456_v23, %v1452_v9  ;;  %v1231_v44 = vshll.u32 %v2651_v12, %v3406_v35 }
 0x23d   : > { %v1564_v42 = vand.u32 65535, %v1560_v17  ;;  %v1565_v37 = vshrl.u32 %v1560_v17, 16  ;;  %v1586_v53 = vand.u32 65535, %v1556_v10  ;;  %v1587_v57 = vshrl.u32 %v1556_v10, 16 }
 0x23e   : > { %v3501_v1 = vshll.u32 %v2652_v16, %v3406_v35  ;;  %v1458_v63 = vadd.s32 536870912, %v1457_v61  ;;  %v1232_v51 = vshrl.u32 %v2652_v16, %v3476_v7  ;;  %v3507_v56 = vshrl.u32 %v2656_v39, %v3476_v7 }
 0x23f   : > { %v1567_v41 = vmul.u32 %v1565_v37, %v1562_v60  ;;  %v1568_v38 = vmul.u32 %v1564_v42, %v1563_v40  ;;  %v1589_v45 = vmul.u32 %v1587_v57, %v1562_v60  ;;  %v1590_v5 = vmul.u32 %v1586_v53, %v1563_v40 }
 0x240   : > { %v3509_v43 = vshrl.u32 %v1458_v63, 30  ;;  %v1529_v32 = vshrl.u32 %v2653_v27, %v3408_v26  ;;  %v1566_v50 = vmul.u32 %v1564_v42, %v1562_v60  ;;  %v1550_v58 = vsel %vm1548_vm11, %v1538_v19, 2102212464 }
 0x241   : > { %v1570_v52 = vshll.u32 %v1567_v41, 16  ;;  %v1569_v36 = vmul.u32 %v1565_v37, %v1563_v40  ;;  %v1588_v2 = vmul.u32 %v1586_v53, %v1562_v60  ;;  %v1592_v15 = vshll.u32 %v1589_v45, 16 }
 0x242   : > { %v1460_v47 = vshll.u32 %v3509_v43, 30  ;;  %v1572_v25 = vshll.u32 %v1568_v38, 16  ;;  %v1594_v48 = vshll.u32 %v1590_v5, 16  ;;  %v1591_v17 = vmul.u32 %v1587_v57, %v1563_v40 }
 0x243   : > { %vm1574_vm3 = vc.u32 %v1566_v50, %v1570_v52  ;;  %v1576_v0 = vadd.s32 %v1570_v52, %v1566_v50  ;;  %vm1596_vm4 = vc.u32 %v1588_v2, %v1592_v15  ;;  %v1598_v9 = vadd.s32 %v1592_v15, %v1588_v2 }
 0x244   : > { %v1575_v13 = vsel %vm1574_vm3, 1, %v2650_v21  ;;  %v3517_v10 = vsub.s32 %v1457_v61, %v1460_v47  ;;  %v1571_v23 = vshrl.u32 %v1567_v41, 16  ;;  %v1597_v60 = vsel %vm1596_vm4, 1, %v2650_v21 }
 0x245   : > { %v1577_v26 = vadd.s32 %v1575_v13, %v1569_v36  ;;  %vm1578_vm15 = vc.u32 %v1576_v0, %v1572_v25  ;;  %vm1600_vm5 = vc.u32 %v1598_v9, %v1594_v48  ;;  %v1599_v53 = vadd.s32 %v1597_v60, %v1591_v17 }
 0x246   : > { %v1579_v19 = vsel %vm1578_vm15, 1, %v2650_v21  ;;  %vm1462_vm6 = vcmp.lt.s32.totalorder %v3517_v10, 0  ;;  %v1463_v42 = vsub.s32 0, %v3517_v10  ;;  %v1549_v61 = vsel %vm1545_vm14, %v1529_v32, %v3441_v8 }
 0x247   : > { %v1581_v37 = vadd.s32 %v1579_v19, %v1577_v26  ;;  %v1551_v40 = vsel %vm1547_vm2, %v3450_v14, %v1550_v58  ;;  %v1573_v57 = vshrl.u32 %v1568_v38, 16  ;;  %v1601_v63 = vsel %vm1600_vm5, 1, %v2650_v21 }
 0x248   : > { %v1464_v41 = vsel %vm1462_vm6, %v1463_v42, %v3517_v10  ;;  %v1593_v52 = vshrl.u32 %v1589_v45, 16  ;;  %v1603_v36 = vadd.s32 %v1601_v63, %v1599_v53  ;;  %v3531_v2 = vor.u32 %v1232_v51, %v1231_v44 }
 0x249   : > { %v1582_v50 = vadd.s32 %v1581_v37, %v1571_v23  ;;  %v1465_v15 = vclz %v1464_v41  ;;  %v1595_v47 = vshrl.u32 %v1590_v5, 16  ;;  %v1069_v25 = vshrl.u32 %v2654_v29, %v3365_v28 }
 0x24a   : > { %v1604_v32 = vadd.s32 %v1603_v36, %v1593_v52  ;;  %v1072_v14 = vshrl.u32 %v2655_v31, %v3365_v28  ;;  %v1075_v38 = vshrl.u32 %v2651_v12, %v3365_v28  ;;  %v1552_v44 = vsel %vm1546_vm13, %v1549_v61, %v1551_v40 }
 0x24b   : > { %v3535_v8 = vadd.s32 %v1582_v50, %v1573_v57  ;;  %v2503_v45 = vadd.s32 4294967294, %v1465_v15  ;;  %v1602_v51 = vadd.s32 %v1598_v9, %v1594_v48  ;;  %v1068_v5 = vshll.u32 %v2653_v27, %v3349_v3 }
 0x24c   : > { %v1605_v58 = vadd.s32 %v1604_v32, %v1595_v47  ;;  %v1058_v0 = vand.u32 8388607, %v1051_v18  ;;  %v1071_v13 = vshll.u32 %v2654_v29, %v3349_v3  ;;  %v1074_v26 = vshll.u32 %v2655_v31, %v3349_v3 }
 0x24d   : > { %vm1240_vm8 = vcmp.lt.s32.totalorder %v3494_v49, 4  ;;  %v1453_v59 = vadd.s32 %v3448_v62, %v3436_v6  ;;  %vm2504_vm10 = vcmp.lt.s32.totalorder %v2503_v45, 0  ;;  %vm1608_vm11 = vc.u32 %v3535_v8, %v1602_v51 }
 0x24e   : > { %v1070_v48 = vor.u32 %v1069_v25, %v1068_v5  ;;  %v1468_v9 = vsel %vm2504_vm10, 0, %v2503_v45  ;;  %v1609_v17 = vadd.s32 1, %v1605_v58  ;;  %v3556_v23 = vor.u32 %v1072_v14, %v1071_v13 }
 0x24f   : > { %v1076_v19 = vor.u32 %v1075_v38, %v1074_v26  ;;  %v1469_v60 = vsub.s32 32, %v1468_v9  ;;  %v1473_v42 = vsub.s32 4294967266, %v1468_v9  ;;  %v1483_v37 = vsub.s32 4, %v3509_v43 }
 0x250   : > { %v1606_v3 = vmul.u32 %v3454_v22, %v1552_v44  ;;  %v1610_v53 = vsel %vm1608_vm11, %v1609_v17, %v1605_v58  ;;  %v1059_v61 = vor.u32 8388608, %v1058_v0  ;;  %vm1083_vm12 = vcmp.lt.s32.totalorder %v3371_v46, 1 }
 0x251   : > { %vm1085_vm14 = vcmp.lt.s32.totalorder %v3371_v46, 3  ;;  %v1470_v6 = vshll.u32 %v3517_v10, %v1468_v9  ;;  %v1471_v62 = vshrl.u32 %v1453_v59, %v1469_v60  ;;  %v1474_v40 = vadd.s32 127, %v1473_v42 }
 0x252   : > { %v1611_v57 = vadd.s32 %v1610_v53, %v1606_v3  ;;  %v1091_v63 = vsel %vm1083_vm12, %v1070_v48, %v3556_v23  ;;  %v1093_v41 = vsel %vm1085_vm14, %v1076_v19, %v3459_v33  ;;  %v1095_v22 = vsel %vm1083_vm12, %v3556_v23, %v1076_v19 }
 0x253   : > { %v1097_v10 = vsel %vm1085_vm14, %v3397_v55, %v3491_v24  ;;  %v1472_v50 = vor.u32 %v1471_v62, %v1470_v6  ;;  %v1475_v52 = vshll.u32 %v1474_v40, 23  ;;  %vm1084_vm2 = vcmp.lt.s32.totalorder %v3371_v46, 2 }
 0x254   : > { %v1612_v36 = vadd.s32 536870912, %v1611_v57  ;;  %v1236_v15 = vor.u32 %v3507_v56, %v3501_v1  ;;  %v1484_v33 = vsel %vm1361_vm7, %v1483_v37, %v3509_v43  ;;  %v1098_v47 = vsel %vm1084_vm2, %v1095_v22, %v1097_v10 }
 0x255   : > { %v3584_v25 = vshll.u32 %v1059_v61, 8  ;;  %v1476_v32 = vor.u32 4788187, %v1475_v52  ;;  %v1094_v55 = vsel %vm1084_vm2, %v1091_v63, %v1093_v41  ;;  %v1102_v24 = vand.u32 65535, %v1098_v47 }
 0x256   : > { %v3586_v14 = vshrl.u32 %v1612_v36, 30  ;;  %v3593_v1 = vsel %vm1240_vm8, %v3531_v2, 920167782  ;;  %vm3597_vm1 = vcmp.le.f32.partialorder %v1359_v11, 0.7853982  ;;  %v1103_v38 = vshrl.u32 %v1098_v47, 16 }
 0x257   : > { %v1100_v43 = vand.u32 65535, %v3584_v25  ;;  %v1477_v45 = vand.u32 2147483647, %v1476_v32  ;;  %v1479_v44 = vcvt.s32.f32 %v1472_v50  ;;  %v1101_v58 = vshrl.u32 %v3584_v25, 16 }
 0x258   : > { %v1614_v5 = vshll.u32 %v3586_v14, 30  ;;  %v3606_v0 = vsel %vm1240_vm8, %v1236_v15, 1326507024  ;;  %v1486_v13 = vsel %vm3597_vm1, 0, %v1484_v33  ;;  %v1125_v26 = vshrl.u32 %v1094_v55, 16 }
 0x259   : > { %v1105_v11 = vmul.u32 %v1103_v38, %v1100_v43  ;;  %v1480_v59 = vmul.f32 %v1479_v44, %v1477_v45  ;;  %v1067_v17 = vshrl.u32 %v2653_v27, %v3365_v28  ;;  %v3612_v60 = vmul.u32 %v1102_v24, %v1101_v58 }
 0x25a   : > { %v1615_v9 = vsub.s32 %v1611_v57, %v1614_v5  ;;  %v1607_v42 = vadd.s32 %v1602_v51, %v3535_v8  ;;  %v1088_v37 = vsel %vm1086_vm9, %v1076_v19, 2102212464  ;;  %v1104_v3 = vmul.u32 %v1102_v24, %v1100_v43 }
 0x25b   : > { %v1108_v53 = vshll.u32 %v1105_v11, 16  ;;  %v1481_v61 = vxor.u32 2147483648, %v1480_v59  ;;  %v1124_v62 = vand.u32 65535, %v1094_v55  ;;  %v1087_v40 = vsel %vm1083_vm12, %v1067_v17, %v1070_v48 }
 0x25c   : > { %vm1616_vm13 = vcmp.lt.s32.totalorder %v1615_v9, 0  ;;  %v1617_v6 = vsub.s32 0, %v1615_v9  ;;  %v3619_v63 = vmul.u32 %v1125_v26, %v1100_v43  ;;  %v1107_v51 = vmul.u32 %v1103_v38, %v1101_v58 }
 0x25d   : > { %vm1112_vm3 = vc.u32 %v1104_v3, %v1108_v53  ;;  %v1114_v57 = vadd.s32 %v1108_v53, %v1104_v3  ;;  %v1482_v28 = vsel %vm1361_vm7, %v1481_v61, %v1480_v59  ;;  %v1110_v19 = vshll.u32 %v3612_v60, 16 }
 0x25e   : > { %v1618_v8 = vsel %vm1616_vm13, %v1617_v6, %v1615_v9  ;;  %v3627_v41 = vsel %vm3597_vm1, %v3325_v30, %v1482_v28  ;;  %v1089_v48 = vsel %vm1085_vm14, %v3556_v23, %v1088_v37  ;;  %v1113_v10 = vsel %vm1112_vm3, 1, %v2650_v21 }
 0x25f   : > { %v1619_v22 = vclz %v1618_v8  ;;  %v1487_v50 = vmul.f32 %v3627_v41, %v3627_v41  ;;  %v1115_v52 = vadd.s32 %v1113_v10, %v1107_v51  ;;  %vm1116_vm9 = vc.u32 %v1114_v57, %v1110_v19 }
 0x260   : > { %v1126_v36 = vmul.u32 %v1124_v62, %v1100_v43  ;;  %v1117_v33 = vsel %vm1116_vm9, 1, %v2650_v21  ;;  %v1128_v47 = vmul.u32 %v1124_v62, %v1101_v58  ;;  %v1130_v32 = vshll.u32 %v3619_v63, 16 }
 0x261   : > { %v2506_v15 = vadd.s32 4294967294, %v1619_v22  ;;  %v1488_v55 = vmul.f32 -0.001358992, %v1487_v50  ;;  %v1495_v24 = vmul.f32 -0.00019511016, %v1487_v50  ;;  %v3637_v56 = vand.u32 3, %v1486_v13 }
 0x262   : > { %v1119_v38 = vadd.s32 %v1117_v33, %v1115_v52  ;;  %v3641_v23 = vsel %vm1084_vm2, %v1087_v40, %v1089_v48  ;;  %v1109_v45 = vshrl.u32 %v1105_v11, 16  ;;  %vm1134_vm15 = vc.u32 %v1126_v36, %v1130_v32 }
 0x263   : > { %vm2507_vm4 = vcmp.lt.s32.totalorder %v2506_v15, 0  ;;  %v1489_v44 = vadd.f32 0.041655596, %v1488_v55  ;;  %v1496_v43 = vadd.f32 0.008332121, %v1495_v24  ;;  %v1129_v59 = vmul.u32 %v1125_v26, %v1101_v58 }
 0x264   : > { %v1622_v5 = vsel %vm2507_vm4, 0, %v2506_v15  ;;  %vm1515_vm5 = vcmp.lt.s32.totalorder %v3347_v4, 0  ;;  %v1132_v3 = vshll.u32 %v1128_v47, 16  ;;  %v1135_v13 = vsel %vm1134_vm15, 1, %v2650_v21 }
 0x265   : > { %v1623_v17 = vsub.s32 32, %v1622_v5  ;;  %v1627_v37 = vsub.s32 4294967266, %v1622_v5  ;;  %v1490_v53 = vmul.f32 %v1489_v44, %v1487_v50  ;;  %v1497_v61 = vmul.f32 %v1496_v43, %v1487_v50 }
 0x266   : > { %v1120_v6 = vadd.s32 %v1119_v38, %v1109_v45  ;;  %v1136_v62 = vadd.s32 %v1130_v32, %v1126_v36  ;;  %v1624_v46 = vshll.u32 %v1615_v9, %v1622_v5  ;;  %v1137_v11 = vadd.s32 %v1135_v13, %v1129_v59 }
 0x267   : > { %v1625_v40 = vshrl.u32 %v1607_v42, %v1623_v17  ;;  %v1628_v57 = vadd.s32 127, %v1627_v37  ;;  %v1491_v28 = vadd.f32 -0.4999988, %v1490_v53  ;;  %v1498_v8 = vadd.f32 -0.16666654, %v1497_v61 }
 0x268   : > { %v1637_v51 = vsub.s32 4, %v3586_v14  ;;  %vm1138_vm6 = vc.u32 %v1136_v62, %v1132_v3  ;;  %vm1505_vm7 = vcmp.eq.s32.totalorder %v3637_v56, 0  ;;  %v1111_v19 = vshrl.u32 %v3612_v60, 16 }
 0x269   : > { %v1626_v58 = vor.u32 %v1625_v40, %v1624_v46  ;;  %v1629_v26 = vshll.u32 %v1628_v57, 23  ;;  %v1139_v22 = vsel %vm1138_vm6, 1, %v2650_v21  ;;  %v1492_v48 = vmul.f32 %v1491_v28, %v1487_v50 }
 0x26a   : > { %v1499_v10 = vmul.f32 %v1498_v8, %v1487_v50  ;;  %vm1504_vm10 = vcmp.lt.s32.totalorder %v3637_v56, 2  ;;  %v1131_v9 = vshrl.u32 %v3619_v63, 16  ;;  %v1141_v42 = vadd.s32 %v1139_v22, %v1137_v11 }
 0x26b   : > { %vm1502_vm11 = vweird.f32 %v3325_v30  ;;  %vm1508_vm12 = vcmp.eq.s32.totalorder %v3637_v56, 2  ;;  %vm3655_vm14 = vcmp.le.f32.partialorder %v1513_v54, 0.7853982  ;;  %v1630_v60 = vor.u32 4788187, %v1629_v26 }
 0x26c   : > { %v3659_v36 = vadd.s32 %v1120_v6, %v1111_v19  ;;  %v1205_v50 = vand.u32 2147483647, %v3328_v34  ;;  %v1493_v15 = vadd.f32 1.0, %v1492_v48  ;;  %v1500_v33 = vadd.f32 1.0, %v1499_v10 }
 0x26d   : > { %v1133_v32 = vshrl.u32 %v1128_v47, 16  ;;  %v1142_v63 = vadd.s32 %v1141_v42, %v1131_v9  ;;  %v1631_v55 = vand.u32 2147483647, %v1630_v60  ;;  %v1633_v24 = vcvt.s32.f32 %v1626_v58 }
 0x26e   : > { %v3662_v38 = vadd.s32 %v1136_v62, %v1132_v3  ;;  %v1144_v45 = vmul.u32 %v3584_v25, %v3641_v23  ;;  %v1501_v54 = vmul.f32 %v1500_v33, %v3627_v41  ;;  %v1509_v44 = vxor.u32 2147483648, %v1493_v15 }
 0x26f   : > { %v1638_v43 = vsel %vm1515_vm5, %v1637_v51, %v3586_v14  ;;  %v1143_v5 = vadd.s32 %v1142_v63, %v1133_v32  ;;  %v1634_v59 = vmul.f32 %v1633_v24, %v1631_v55  ;;  %v1212_v47 = vand.u32 8388607, %v1205_v50 }
 0x270   : > { %vm1146_vm2 = vc.u32 %v3659_v36, %v3662_v38  ;;  %v1226_v17 = vshrl.u32 %v2655_v31, %v3476_v7  ;;  %v1506_v37 = vxor.u32 2147483648, %v1501_v54  ;;  %v1223_v41 = vshrl.u32 %v2654_v29, %v3476_v7 }
 0x271   : > { %v1147_v25 = vadd.s32 1, %v1143_v5  ;;  %v1225_v23 = vshll.u32 %v2654_v29, %v3406_v35  ;;  %v1635_v14 = vxor.u32 2147483648, %v1634_v59  ;;  %v1222_v3 = vshll.u32 %v2653_v27, %v3406_v35 }
 0x272   : > { %v1228_v13 = vshll.u32 %v2655_v31, %v3406_v35  ;;  %v1229_v53 = vshrl.u32 %v2651_v12, %v3476_v7  ;;  %v1507_v61 = vsel %vm1505_vm7, %v1493_v15, %v1506_v37  ;;  %v1510_v6 = vsel %vm1508_vm12, %v1509_v44, %v1501_v54 }
 0x273   : > { %v1148_v62 = vsel %vm1146_vm2, %v1147_v25, %v1143_v5  ;;  %v3690_v46 = vor.u32 %v1226_v17, %v1225_v23  ;;  %v1511_v40 = vsel %vm1504_vm10, %v1507_v61, %v1510_v6  ;;  %v1636_v57 = vsel %vm1515_vm5, %v1635_v14, %v1634_v59 }
 0x274   : > { %v1149_v11 = vadd.s32 %v1148_v62, %v1144_v45  ;;  %v3696_v35 = vor.u32 %v1229_v53, %v1228_v13  ;;  %v1512_v28 = vsel %vm1502_vm11, nan, %v1511_v40  ;;  %v1639_v8 = vsel %vm3655_vm14, %v3347_v4, %v1636_v57 }
 0x275   : > { %v1213_v51 = vor.u32 8388608, %v1212_v47  ;;  %v3703_v58 = vor.u32 %v1223_v41, %v1222_v3  ;;  %1703 = vmatpush.msrb.mxu2 %v1512_v28  ;;  %v1641_v26 = vmul.f32 %v1639_v8, %v1639_v8  ;;  %vm1237_vm1 = vcmp.lt.s32.totalorder %v3494_v49, 1 }
 0x276   : > { %v1150_v56 = vadd.s32 536870912, %v1149_v11  ;;  %vm1239_vm13 = vcmp.lt.s32.totalorder %v3494_v49, 3  ;;  %v1640_v19 = vsel %vm3655_vm14, 0, %v1638_v43  ;;  %v1249_v30 = vsel %vm1237_vm1, %v3690_v46, %v3696_v35 }
 0x277   : > { %v1251_v22 = vsel %vm1239_vm13, %v3531_v2, %v3606_v0  ;;  %v1642_v48 = vmul.f32 -0.001358992, %v1641_v26  ;;  %v1649_v10 = vmul.f32 -0.00019511016, %v1641_v26  ;;  %vm1238_vm3 = vcmp.lt.s32.totalorder %v3494_v49, 2 }
 0x278   : > { %v3717_v9 = vshrl.u32 %v1150_v56, 30  ;;  %v1245_v42 = vsel %vm1237_vm1, %v3703_v58, %v3690_v46  ;;  %v1247_v52 = vsel %vm1239_vm13, %v3696_v35, %v3593_v1  ;;  %v1252_v60 = vsel %vm1238_vm3, %v1249_v30, %v1251_v22 }
 0x279   : > { %v3730_v2 = vshll.u32 %v1213_v51, 8  ;;  %v1643_v0 = vadd.f32 0.041655596, %v1642_v48  ;;  %v1650_v15 = vadd.f32 0.008332121, %v1649_v10  ;;  %v1657_v32 = vand.u32 3, %v1640_v19 }
 0x27a   : > { %v1152_v33 = vshll.u32 %v3717_v9, 30  ;;  %v1256_v55 = vand.u32 65535, %v1252_v60  ;;  %v1257_v24 = vshrl.u32 %v1252_v60, 16  ;;  %v1248_v1 = vsel %vm1238_vm3, %v1245_v42, %v1247_v52 }
 0x27b   : > { %v1254_v63 = vand.u32 65535, %v3730_v2  ;;  %v1644_v45 = vmul.f32 %v1643_v0, %v1641_v26  ;;  %v1651_v54 = vmul.f32 %v1650_v15, %v1641_v26  ;;  %v1255_v43 = vshrl.u32 %v3730_v2, 16 }
 0x27c   : > { %v1153_v44 = vsub.s32 %v1149_v11, %v1152_v33  ;;  %v1279_v41 = vshrl.u32 %v1248_v1, 16  ;;  %vm1658_vm4 = vcmp.lt.s32.totalorder %v1657_v32, 2  ;;  %vm1656_vm15 = vweird.f32 %v3347_v4 }
 0x27d   : > { %v1259_v5 = vmul.u32 %v1257_v24, %v1254_v63  ;;  %v1645_v59 = vadd.f32 -0.4999988, %v1644_v45  ;;  %v1652_v47 = vadd.f32 -0.16666654, %v1651_v54  ;;  %v3737_v37 = vmul.u32 %v1256_v55, %v1255_v43 }
 0x27e   : > { %vm1154_vm9 = vcmp.lt.s32.totalorder %v1153_v44, 0  ;;  %v1155_v17 = vsub.s32 0, %v1153_v44  ;;  %v1258_v13 = vmul.u32 %v1256_v55, %v1254_v63  ;;  %vm1659_vm5 = vcmp.eq.s32.totalorder %v1657_v32, 0 }
 0x27f   : > { %v1262_v25 = vshll.u32 %v1259_v5, 16  ;;  %v1646_v23 = vmul.f32 %v1645_v59, %v1641_v26  ;;  %v1653_v14 = vmul.f32 %v1652_v47, %v1641_v26  ;;  %vm1662_vm6 = vcmp.eq.s32.totalorder %v1657_v32, 2 }
 0x280   : > { %v1156_v3 = vsel %vm1154_vm9, %v1155_v17, %v1153_v44  ;;  %v1278_v61 = vand.u32 65535, %v1248_v1  ;;  %v1261_v40 = vmul.u32 %v1257_v24, %v1255_v43  ;;  %v1264_v11 = vshll.u32 %v3737_v37, 16 }
 0x281   : > { %v1157_v53 = vclz %v1156_v3  ;;  %v1647_v6 = vadd.f32 1.0, %v1646_v23  ;;  %v1654_v62 = vadd.f32 1.0, %v1653_v14  ;;  %vm1266_vm7 = vc.u32 %v1258_v13, %v1262_v25 }
 0x282   : > { %v1267_v28 = vsel %vm1266_vm7, 1, %v2650_v21  ;;  %v1268_v51 = vadd.s32 %v1262_v25, %v1258_v13  ;;  %v1281_v30 = vmul.u32 %v1279_v41, %v1254_v63  ;;  %v1145_v22 = vadd.s32 %v3662_v38, %v3659_v36 }
 0x283   : > { %v2497_v57 = vadd.s32 4294967294, %v1157_v53  ;;  %v1655_v26 = vmul.f32 %v1654_v62, %v1639_v8  ;;  %v1663_v56 = vxor.u32 2147483648, %v1647_v6  ;;  %v1269_v19 = vadd.s32 %v1267_v28, %v1261_v40 }
 0x284   : > { %v1263_v48 = vshrl.u32 %v1259_v5, 16  ;;  %vm1270_vm11 = vc.u32 %v1268_v51, %v1264_v11  ;;  %v1282_v60 = vmul.u32 %v1278_v61, %v1255_v43  ;;  %v1280_v55 = vmul.u32 %v1278_v61, %v1254_v63 }
 0x285   : > { %vm2498_vm10 = vcmp.lt.s32.totalorder %v2497_v57, 0  ;;  %v1660_v10 = vxor.u32 2147483648, %v1655_v26  ;;  %v1271_v52 = vsel %vm1270_vm11, 1, %v2650_v21  ;;  %v1664_v24 = vsel %vm1662_vm6, %v1663_v56, %v1655_v26 }
 0x286   : > { %v1160_v42 = vsel %vm2498_vm10, 0, %v2497_v57  ;;  %v1273_v33 = vadd.s32 %v1271_v52, %v1269_v19  ;;  %v1283_v45 = vmul.u32 %v1279_v41, %v1255_v43  ;;  %v1284_v54 = vshll.u32 %v1281_v30, 16 }
 0x287   : > { %v1161_v0 = vsub.s32 32, %v1160_v42  ;;  %v1165_v15 = vsub.s32 4294967266, %v1160_v42  ;;  %v1661_v8 = vsel %vm1659_vm5, %v1647_v6, %v1660_v10  ;;  %v1162_v38 = vshll.u32 %v1153_v44, %v1160_v42 }
 0x288   : > { %v1665_v36 = vsel %vm1658_vm4, %v1661_v8, %v1664_v24  ;;  %v1286_v47 = vshll.u32 %v1282_v60, 16  ;;  %vm1288_vm12 = vc.u32 %v1280_v55, %v1284_v54  ;;  %v1290_v17 = vadd.s32 %v1284_v54, %v1280_v55 }
 0x289   : > { %v1163_v1 = vshrl.u32 %v1145_v22, %v1161_v0  ;;  %v1166_v5 = vadd.s32 127, %v1165_v15  ;;  %v1666_v59 = vsel %vm1656_vm15, nan, %v1665_v36  ;;  %v1274_v23 = vadd.s32 %v1273_v33, %v1263_v48 }
 0x28a   : > { %1726 = vmatpush.msrb.mxu3 %v1666_v59  ;;  %v1289_v14 = vsel %vm1288_vm12, 1, %v2650_v21  ;;  %v1221_v43 = vshrl.u32 %v2653_v27, %v3476_v7  ;;  %v1242_v32 = vsel %vm1240_vm8, %v3696_v35, 2102212464  ;;  %vm1292_vm14 = vc.u32 %v1290_v17, %v1286_v47 }
 0x28b   : > { %v1164_v25 = vor.u32 %v1163_v1, %v1162_v38  ;;  %v1167_v63 = vshll.u32 %v1166_v5, 23  ;;  %v1291_v44 = vadd.s32 %v1289_v14, %v1283_v45  ;;  %v1265_v41 = vshrl.u32 %v3737_v37, 16 }
 0x28c   : > { %v1293_v3 = vsel %vm1292_vm14, 1, %v2650_v21  ;;  %v1241_v13 = vsel %vm1237_vm1, %v1221_v43, %v3703_v58  ;;  %v1285_v53 = vshrl.u32 %v1281_v30, 16  ;;  %v1243_v7 = vsel %vm1239_vm13, %v3690_v46, %v1242_v32 }
 0x28d   : > { %v1168_v4 = vor.u32 4788187, %v1167_v63  ;;  %v1295_v61 = vadd.s32 %v1293_v3, %v1291_v44  ;;  %v1171_v62 = vcvt.s32.f32 %v1164_v25  ;;  %v1275_v35 = vadd.s32 %v1274_v23, %v1265_v41 }
 0x28e   : > { %v1287_v40 = vshrl.u32 %v1282_v60, 16  ;;  %v1294_v28 = vadd.s32 %v1290_v17, %v1286_v47  ;;  %v1244_v37 = vsel %vm1238_vm3, %v1241_v13, %v1243_v7  ;;  %vm1053_vm2 = vcmp.lt.s32.totalorder %v3322_v20, 0 }
 0x28f   : > { %v1169_v6 = vand.u32 2147483647, %v1168_v4  ;;  %v1296_v57 = vadd.s32 %v1295_v61, %v1285_v53  ;;  %vm3769_vm1 = vcmp.le.f32.partialorder %v1051_v18, 0.7853982  ;;  %v1298_v19 = vmul.u32 %v3730_v2, %v1244_v37 }
 0x290   : > { %vm1300_vm8 = vc.u32 %v1275_v35, %v1294_v28  ;;  %v1175_v10 = vsub.s32 4, %v3717_v9  ;;  %vm1194_vm3 = vweird.f32 %v3322_v20  ;;  %v1299_v3 = vadd.s32 %v1294_v28, %v1275_v35  ;;  %v2509_v35 = vld [vmem:[%s4252_s1 + $0x28] sm:$0xff] }
 0x291   : > { %v1172_v11 = vmul.f32 %v1171_v62, %v1169_v6  ;;  %v1297_v51 = vadd.s32 %v1296_v57, %v1287_v40  ;;  %vm1207_vm6 = vcmp.lt.s32.totalorder %v3328_v34, 0  ;;  %vm3799_vm7 = vcmp.le.f32.partialorder %v1205_v50, 0.7853982 }
 0x292   : > { %v1176_v2 = vsel %vm1053_vm2, %v1175_v10, %v3717_v9  ;;  %vm1348_vm14 = vweird.f32 %v3328_v34 }
 0x293   : > { %v1173_v26 = vxor.u32 2147483648, %v1172_v11  ;;  %v1301_v58 = vadd.s32 1, %v1297_v51  ;;  %v1178_v36 = vsel %vm3769_vm1, 0, %v1176_v2 }
 0x294   : > { %v1195_v25 = vand.u32 3, %v1178_v36 }
 0x295   : > { %v1174_v46 = vsel %vm1053_vm2, %v1173_v26, %v1172_v11  ;;  %v1302_v30 = vsel %vm1300_vm8, %v1301_v58, %v1297_v51 }
 0x296   : > { %v1177_v49 = vsel %vm3769_vm1, %v3322_v20, %v1174_v46  ;;  %v1303_v48 = vadd.s32 %v1302_v30, %v1298_v19  ;;  %vm1197_vm9 = vcmp.eq.s32.totalorder %v1195_v25, 0  ;;  %vm1200_vm4 = vcmp.eq.s32.totalorder %v1195_v25, 2  ;;  %v2508_v20 = vld [vmem:[%s4252_s1 + $0x20] sm:$0xff] }
 0x297   : > { %v1179_v22 = vmul.f32 %v1177_v49, %v1177_v49  ;;  %vm1196_vm5 = vcmp.lt.s32.totalorder %v1195_v25, 2  ;;  %v2510_v46 = vld [vmem:[%s4253_s2 + $0x20] sm:$0xff] }
 0x298   : > { %v1304_v18 = vadd.s32 536870912, %v1303_v48  ;;  %1675 = vperm.xlu2 %2585, %v2510_v46  }
 0x299   : > { %v1180_v42 = vmul.f32 -0.001358992, %v1179_v22  ;;  %v1187_v52 = vmul.f32 -0.00019511016, %v1179_v22 }
 0x29a   : > { %v3780_v15 = vshrl.u32 %v1304_v18, 30 }
 0x29b   : > { %v1181_v60 = vadd.f32 0.041655596, %v1180_v42  ;;  %v1188_v0 = vadd.f32 0.008332121, %v1187_v52  ;;  %v2511_v42 = vld [vmem:[%s4253_s2 + $0x28] sm:$0xff] }
 0x29c   : > { %v1306_v8 = vshll.u32 %v3780_v15, 30 }
 0x29d   : > { %v1182_v33 = vmul.f32 %v1181_v60, %v1179_v22  ;;  %v1189_v55 = vmul.f32 %v1188_v0, %v1179_v22 }
 0x29e   : > { %v1307_v54 = vsub.s32 %v1303_v48, %v1306_v8 }
 0x29f   : > { %v1183_v24 = vadd.f32 -0.4999988, %v1182_v33  ;;  %v1190_v45 = vadd.f32 -0.16666654, %v1189_v55 }
 0x2a0   : > { %vm1308_vm13 = vcmp.lt.s32.totalorder %v1307_v54, 0  ;;  %v1309_v5 = vsub.s32 0, %v1307_v54  ;;  %1680 = vperm.xlu2 %2585, %v2511_v42  }
 0x2a1   : > { %v1184_v38 = vmul.f32 %v1183_v24, %v1179_v22  ;;  %v1191_v1 = vmul.f32 %v1190_v45, %v1179_v22  ;;  %v1329_v22 = vsub.s32 4, %v3780_v15 }
 0x2a2   : > { %v1310_v17 = vsel %vm1308_vm13, %v1309_v5, %v1307_v54 }
 0x2a3   : > { %v1185_v59 = vadd.f32 1.0, %v1184_v38  ;;  %v1192_v47 = vadd.f32 1.0, %v1191_v1  ;;  %v1311_v63 = vclz %v1310_v17  ;;  %v1330_v60 = vsel %vm1207_vm6, %v1329_v22, %v3780_v15 }
 0x2a4   : > { %v1332_v33 = vsel %vm3799_vm7, 0, %v1330_v60 }
 0x2a5   : > { %v1193_v9 = vmul.f32 %v1192_v47, %v1177_v49  ;;  %v1201_v23 = vxor.u32 2147483648, %v1185_v59  ;;  %v2500_v14 = vadd.s32 4294967294, %v1311_v63 }
 0x2a7   : > { %v1198_v43 = vxor.u32 2147483648, %v1193_v9  ;;  %vm2501_vm15 = vcmp.lt.s32.totalorder %v2500_v14, 0  ;;  %v1202_v44 = vsel %vm1200_vm4, %v1201_v23, %v1193_v9 }
 0x2a8   : > { %v1314_v4 = vsel %vm2501_vm15, 0, %v2500_v14 }
 0x2a9   : > { %v1199_v32 = vsel %vm1197_vm9, %v1185_v59, %v1198_v43  ;;  %v1315_v13 = vsub.s32 32, %v1314_v4  ;;  %v1319_v53 = vsub.s32 4294967266, %v1314_v4  ;;  %v1316_v6 = vshll.u32 %v1307_v54, %v1314_v4 }
 0x2aa   : > { %v1203_v41 = vsel %vm1196_vm5, %v1199_v32, %v1202_v44  ;;  %v1349_v54 = vand.u32 3, %v1332_v33 }
 0x2ab   : > { %v1204_v61 = vsel %vm1194_vm3, nan, %v1203_v41  ;;  %v1317_v62 = vshrl.u32 %v1299_v3, %v1315_v13  ;;  %v1320_v7 = vadd.s32 127, %v1319_v53 }
 0x2ac   : > { %1704 = vmatpush.msrb.mxu2 %v1204_v61  ;;  %vm1351_vm10 = vcmp.eq.s32.totalorder %v1349_v54, 0  ;;  %vm1354_vm11 = vcmp.eq.s32.totalorder %v1349_v54, 2  ;;  %vm1350_vm12 = vcmp.lt.s32.totalorder %v1349_v54, 2 }
 0x2ad   : > { %v1318_v40 = vor.u32 %v1317_v62, %v1316_v6  ;;  %v1321_v57 = vshll.u32 %v1320_v7, 23  ;;  %2512 = vmatmul.msk.f32.vlgmr.msrb.gmra.mxu2 %vm218_vm0, %v2508_v20 }
 0x2af   : > { %v1322_v11 = vor.u32 4788187, %v1321_v57  ;;  %v1325_v51 = vcvt.s32.f32 %v1318_v40 }
 0x2b1   : > { %v1323_v37 = vand.u32 2147483647, %v1322_v11 }
 0x2b3   : > { %v1326_v26 = vmul.f32 %v1325_v51, %v1323_v37 }
 0x2b5   : > { %v1327_v28 = vxor.u32 2147483648, %v1326_v26  ;;  %2513 = vmatmul.msk.f32.gmra.mxu2 %vm218_vm0, %v2509_v35 }
 0x2b7   : > { %v1328_v56 = vsel %vm1207_vm6, %v1327_v28, %v1326_v26 }
 0x2b8   : > { %v1331_v19 = vsel %vm3799_vm7, %v3328_v34, %v1328_v56 }
 0x2b9   : > { %v1333_v49 = vmul.f32 %v1331_v19, %v1331_v19 }
 0x2bb   : > { %v1334_v30 = vmul.f32 -0.001358992, %v1333_v49  ;;  %v1341_v50 = vmul.f32 -0.00019511016, %v1333_v49 }
 0x2bd   : > { %v1335_v48 = vadd.f32 0.041655596, %v1334_v30  ;;  %v1342_v10 = vadd.f32 0.008332121, %v1341_v50 }
 0x2bf   : > { %v1336_v52 = vmul.f32 %v1335_v48, %v1333_v49  ;;  %v1343_v18 = vmul.f32 %v1342_v10, %v1333_v49 }
 0x2c1   : > { %v1337_v0 = vadd.f32 -0.4999988, %v1336_v52  ;;  %v1344_v2 = vadd.f32 -0.16666654, %v1343_v18 }
 0x2c3   : > { %v1338_v55 = vmul.f32 %v1337_v0, %v1333_v49  ;;  %v1345_v8 = vmul.f32 %v1344_v2, %v1333_v49 }
 0x2c5   : > { %v1339_v24 = vadd.f32 1.0, %v1338_v55  ;;  %v1346_v45 = vadd.f32 1.0, %v1345_v8 }
 0x2c7   : > { %v1347_v36 = vmul.f32 %v1346_v45, %v1331_v19  ;;  %v1355_v38 = vxor.u32 2147483648, %v1339_v24 }
 0x2c9   : > { %v1352_v1 = vxor.u32 2147483648, %v1347_v36  ;;  %v1356_v59 = vsel %vm1354_vm11, %v1355_v38, %v1347_v36 }
 0x2cb   : > { %v1353_v5 = vsel %vm1351_vm10, %v1339_v24, %v1352_v1 }
 0x2cc   : > { %v1357_v15 = vsel %vm1350_vm12, %v1353_v5, %v1356_v59 }
 0x2cd   : > { %v1358_v47 = vsel %vm1348_vm14, nan, %v1357_v15 }
 0x2ce   : > { %1727 = vmatpush.msrb.mxu3 %v1358_v47 }
 0x2cf   : > { %2514 = vmatmul.msk.f32.vlgmr.msrb.gmra.mxu3 %vm218_vm0, %v2508_v20 }
 0x2d7   : > { %2515 = vmatmul.msk.f32.gmra.mxu3 %vm218_vm0, %v2509_v35 }
 0x2f2   : > { %v3824_v17 = vpop.permute.xlu2 %1675 }
 0x330   : > { %v1706_v25 = vpop.f32.mrf.mxu2 }
 0x331   : > { %v3827_v63 = vadd.f32 %v1706_v25, %v3824_v17 }
 0x333   : > { %v1738_v9 = vand.u32 2139095040, %v3827_v63  ;;  %v1735_v43 = vand.u32 2147483647, %v3827_v63  ;;  %vm1737_vm7 = vcmp.lt.s32.totalorder %v3827_v63, 0 }
 0x335   : > { %v1739_v23 = vshrl.u32 %v1738_v9, 23  ;;  %v1742_v32 = vand.u32 8388607, %v1735_v43  ;;  %vm3903_vm11 = vcmp.le.f32.partialorder %v1735_v43, 0.7853982 }
 0x337   : > { %v2516_v14 = vadd.s32 4294967169, %v1739_v23  ;;  %v1743_v3 = vor.u32 8388608, %v1742_v32 }
 0x339   : > { %v1745_v34 = vadd.s32 1, %v2516_v14  ;;  %v3846_v56 = vshll.u32 %v1743_v3, 8 }
 0x33b   : > { %vm1746_vm8 = vcmp.gt.s32.totalorder %v1745_v34, 0  ;;  %v1784_v42 = vand.u32 65535, %v3846_v56  ;;  %v1785_v52 = vshrl.u32 %v3846_v56, 16 }
 0x33c   : > { %v1747_v44 = vsel %vm1746_vm8, %v1745_v34, 0 }
 0x33d   : > { %v1749_v4 = vand.u32 31, %v1747_v44  ;;  %v3833_v13 = vshrl.u32 %v1747_v44, 5 }
 0x33f   : > { %v1750_v41 = vsub.s32 32, %v1749_v4  ;;  %v1752_v53 = vshll.u32 %v2653_v27, %v1749_v4  ;;  %v1755_v61 = vshll.u32 %v2654_v29, %v1749_v4  ;;  %v1758_v7 = vshll.u32 %v2655_v31, %v1749_v4 }
 0x340   : > { %v1761_v57 = vshll.u32 %v2651_v12, %v1749_v4  ;;  %v1764_v11 = vshll.u32 %v2652_v16, %v1749_v4  ;;  %vm1767_vm0 = vcmp.lt.s32.totalorder %v3833_v13, 1  ;;  %vm1770_vm2 = vcmp.lt.s32.totalorder %v3833_v13, 4 }
 0x341   : > { %v1753_v6 = vshrl.u32 %v2654_v29, %v1750_v41  ;;  %v1756_v62 = vshrl.u32 %v2655_v31, %v1750_v41  ;;  %v1759_v40 = vshrl.u32 %v2651_v12, %v1750_v41  ;;  %v1762_v20 = vshrl.u32 %v2652_v16, %v1750_v41 }
 0x342   : > { %v1765_v37 = vshrl.u32 %v2656_v39, %v1750_v41  ;;  %vm1769_vm1 = vcmp.lt.s32.totalorder %v3833_v13, 3  ;;  %vm1768_vm13 = vcmp.lt.s32.totalorder %v3833_v13, 2  ;;  %v1751_v4 = vshrl.u32 %v2653_v27, %v1750_v41 }
 0x343   : > { %v1754_v51 = vor.u32 %v1753_v6, %v1752_v53  ;;  %v1757_v26 = vor.u32 %v1756_v62, %v1755_v61  ;;  %v1760_v35 = vor.u32 %v1759_v40, %v1758_v7  ;;  %v1763_v28 = vor.u32 %v1762_v20, %v1761_v57 }
 0x344   : > { %v1766_v58 = vor.u32 %v1765_v37, %v1764_v11 }
 0x345   : > { %v1775_v46 = vsel %vm1767_vm0, %v1754_v51, %v1757_v26  ;;  %v1779_v19 = vsel %vm1767_vm0, %v1757_v26, %v1760_v35  ;;  %v1776_v49 = vsel %vm1770_vm2, %v1763_v28, 920167782  ;;  %v1772_v34 = vsel %vm1770_vm2, %v1760_v35, 2102212464 }
 0x346   : > { %v1780_v30 = vsel %vm1770_vm2, %v1766_v58, 1326507024  ;;  %v1777_v50 = vsel %vm1769_vm1, %v1760_v35, %v1776_v49  ;;  %v1771_v7 = vsel %vm1767_vm0, %v1751_v4, %v1754_v51  ;;  %v1773_v40 = vsel %vm1769_vm1, %v1757_v26, %v1772_v34 }
 0x347   : > { %v1781_v22 = vsel %vm1769_vm1, %v1763_v28, %v1780_v30  ;;  %v1778_v48 = vsel %vm1768_vm13, %v1775_v46, %v1777_v50  ;;  %v1774_v41 = vsel %vm1768_vm13, %v1771_v7, %v1773_v40 }
 0x348   : > { %v1782_v10 = vsel %vm1768_vm13, %v1779_v19, %v1781_v22  ;;  %v1808_v0 = vand.u32 65535, %v1778_v48  ;;  %v1809_v2 = vshrl.u32 %v1778_v48, 16  ;;  %v1828_v51 = vmul.u32 %v3846_v56, %v1774_v41 }
 0x349   : > { %v1786_v18 = vand.u32 65535, %v1782_v10  ;;  %v1787_v60 = vshrl.u32 %v1782_v10, 16 }
 0x34a   : > { %v1811_v8 = vmul.u32 %v1809_v2, %v1784_v42  ;;  %v1812_v24 = vmul.u32 %v1808_v0, %v1785_v52  ;;  %v1810_v38 = vmul.u32 %v1808_v0, %v1784_v42  ;;  %v1813_v15 = vmul.u32 %v1809_v2, %v1785_v52 }
 0x34b   : > { %v1789_v33 = vmul.u32 %v1787_v60, %v1784_v42  ;;  %v1790_v55 = vmul.u32 %v1786_v18, %v1785_v52  ;;  %v1788_v45 = vmul.u32 %v1786_v18, %v1784_v42  ;;  %v1791_v36 = vmul.u32 %v1787_v60, %v1785_v52 }
 0x34c   : > { %v1814_v1 = vshll.u32 %v1811_v8, 16  ;;  %v1816_v25 = vshll.u32 %v1812_v24, 16  ;;  %v1815_v6 = vshrl.u32 %v1811_v8, 16  ;;  %v1817_v11 = vshrl.u32 %v1812_v24, 16 }
 0x34d   : > { %v1792_v54 = vshll.u32 %v1789_v33, 16  ;;  %v1794_v5 = vshll.u32 %v1790_v55, 16  ;;  %v1793_v3 = vshrl.u32 %v1789_v33, 16  ;;  %v1795_v57 = vshrl.u32 %v1790_v55, 16 }
 0x34e   : > { %vm1818_vm9 = vc.u32 %v1810_v38, %v1814_v1  ;;  %v1820_v9 = vadd.s32 %v1814_v1, %v1810_v38 }
 0x34f   : > { %vm1796_vm3 = vc.u32 %v1788_v45, %v1792_v54  ;;  %v1798_v59 = vadd.s32 %v1792_v54, %v1788_v45  ;;  %v1819_v14 = vsel %vm1818_vm9, 1, %v2650_v21 }
 0x350   : > { %v1797_v47 = vsel %vm1796_vm3, 1, %v2650_v21  ;;  %v1821_v44 = vadd.s32 %v1819_v14, %v1813_v15  ;;  %vm1822_vm15 = vc.u32 %v1820_v9, %v1816_v25  ;;  %v1824_v28 = vadd.s32 %v1820_v9, %v1816_v25  ;;  %v1709_v14 = vpop.f32.mrf.mxu2 }
 0x351   : > { %v1799_v23 = vadd.s32 %v1797_v47, %v1791_v36  ;;  %vm1800_vm4 = vc.u32 %v1798_v59, %v1794_v5  ;;  %v1823_v61 = vsel %vm1822_vm15, 1, %v2650_v21 }
 0x352   : > { %v1801_v32 = vsel %vm1800_vm4, 1, %v2650_v21  ;;  %v1825_v62 = vadd.s32 %v1823_v61, %v1821_v44  ;;  %v1729_v46 = vpop.f32.mrf.mxu3 }
 0x353   : > { %v1803_v53 = vadd.s32 %v1801_v32, %v1799_v23  ;;  %v3883_v19 = vadd.f32 %v1729_v46, %v3824_v17 }
 0x354   : > { %v1826_v37 = vadd.s32 %v1825_v62, %v1815_v6  ;;  %v3915_v6 = vpop.permute.xlu2 %1680 }
 0x355   : > { %v1804_v20 = vadd.s32 %v1803_v53, %v1793_v3  ;;  %v1889_v26 = vand.u32 2147483647, %v3883_v19  ;;  %v1892_v30 = vand.u32 2139095040, %v3883_v19  ;;  %v3920_v7 = vadd.f32 %v1709_v14, %v3915_v6 }
 0x356   : > { %v1827_v58 = vadd.s32 %v1826_v37, %v1817_v11 }
 0x357   : > { %v1805_v35 = vadd.s32 %v1804_v20, %v1795_v57  ;;  %v1893_v48 = vshrl.u32 %v1892_v30, 23  ;;  %v1896_v13 = vand.u32 8388607, %v1889_v26  ;;  %v2043_v30 = vand.u32 2147483647, %v3920_v7 }
 0x358   : > { %v1831_v49 = vadd.s32 1, %v1827_v58 }
 0x359   : > { %vm1830_vm5 = vc.u32 %v1805_v35, %v1824_v28  ;;  %v2519_v42 = vadd.s32 4294967169, %v1893_v48  ;;  %v1897_v17 = vor.u32 8388608, %v1896_v13  ;;  %v1829_v3 = vadd.s32 %v1824_v28, %v1805_v35 }
 0x35a   : > { %v1832_v50 = vsel %vm1830_vm5, %v1831_v49, %v1827_v58 }
 0x35b   : > { %v1833_v22 = vadd.s32 %v1832_v50, %v1828_v51  ;;  %v1899_v18 = vadd.s32 1, %v2519_v42  ;;  %v3891_v8 = vshll.u32 %v1897_v17, 8 }
 0x35d   : > { %v1834_v10 = vadd.s32 536870912, %v1833_v22  ;;  %vm1900_vm6 = vcmp.gt.s32.totalorder %v1899_v18, 0  ;;  %v1938_v35 = vand.u32 65535, %v3891_v8  ;;  %v1939_v51 = vshrl.u32 %v3891_v8, 16 }
 0x35e   : > { %v1901_v0 = vsel %vm1900_vm6, %v1899_v18, 0 }
 0x35f   : > { %v1835_v52 = vshrl.u32 %v1834_v10, 30  ;;  %v1903_v56 = vand.u32 31, %v1901_v0  ;;  %v3893_v24 = vshrl.u32 %v1901_v0, 5 }
 0x361   : > { %v1836_v60 = vshll.u32 %v1835_v52, 30  ;;  %v1904_v55 = vsub.s32 32, %v1903_v56  ;;  %v1906_v45 = vshll.u32 %v2653_v27, %v1903_v56  ;;  %v1909_v54 = vshll.u32 %v2654_v29, %v1903_v56 }
 0x362   : > { %v1912_v36 = vshll.u32 %v2655_v31, %v1903_v56  ;;  %v1915_v59 = vshll.u32 %v2651_v12, %v1903_v56  ;;  %v1859_v34 = vsub.s32 4, %v1835_v52  ;;  %v1918_v4 = vshll.u32 %v2652_v16, %v1903_v56 }
 0x363   : > { %v1837_v2 = vsub.s32 %v1833_v22, %v1836_v60  ;;  %v1907_v1 = vshrl.u32 %v2654_v29, %v1904_v55  ;;  %v1910_v5 = vshrl.u32 %v2655_v31, %v1904_v55  ;;  %v1913_v25 = vshrl.u32 %v2651_v12, %v1904_v55 }
 0x364   : > { %v1916_v9 = vshrl.u32 %v2652_v16, %v1904_v55  ;;  %v1919_v23 = vshrl.u32 %v2656_v39, %v1904_v55  ;;  %vm1921_vm12 = vcmp.lt.s32.totalorder %v3893_v24, 1  ;;  %vm1924_vm14 = vcmp.lt.s32.totalorder %v3893_v24, 4 }
 0x365   : > { %vm1838_vm10 = vcmp.lt.s32.totalorder %v1837_v2, 0  ;;  %v1839_v33 = vsub.s32 0, %v1837_v2  ;;  %v3910_v32 = vor.u32 %v1907_v1, %v1906_v45  ;;  %v3912_v44 = vor.u32 %v1910_v5, %v1909_v54 }
 0x366   : > { %v1914_v53 = vor.u32 %v1913_v25, %v1912_v36  ;;  %v1917_v61 = vor.u32 %v1916_v9, %v1915_v59  ;;  %v1920_v62 = vor.u32 %v1919_v23, %v1918_v4  ;;  %vm1923_vm0 = vcmp.lt.s32.totalorder %v3893_v24, 3 }
 0x367   : > { %v1840_v38 = vsel %vm1838_vm10, %v1839_v33, %v1837_v2  ;;  %v1929_v40 = vsel %vm1921_vm12, %v3910_v32, %v3912_v44  ;;  %v3931_v11 = vsel %vm1737_vm7, %v1859_v34, %v1835_v52  ;;  %vm1922_vm2 = vcmp.lt.s32.totalorder %v3893_v24, 2 }
 0x368   : > { %v1841_v47 = vclz %v1840_v38  ;;  %v1930_v57 = vsel %vm1924_vm14, %v1917_v61, 920167782  ;;  %v1933_v58 = vsel %vm1921_vm12, %v3912_v44, %v1914_v53  ;;  %v1934_v49 = vsel %vm1924_vm14, %v1920_v62, 1326507024 }
 0x369   : > { %v1931_v37 = vsel %vm1923_vm0, %v1914_v53, %v1930_v57  ;;  %v1935_v10 = vsel %vm1923_vm0, %v1917_v61, %v1934_v49  ;;  %v1862_v42 = vsel %vm3903_vm11, 0, %v3931_v11  ;;  %v2046_v45 = vand.u32 2139095040, %v3920_v7 }
 0x36a   : > { %v2517_v43 = vadd.s32 4294967294, %v1841_v47  ;;  %v1932_v46 = vsel %vm1922_vm2, %v1929_v40, %v1931_v37  ;;  %v1936_v13 = vsel %vm1922_vm2, %v1933_v58, %v1935_v10  ;;  %v3956_v54 = vand.u32 8388607, %v2043_v30 }
 0x36b   : > { %v1962_v52 = vand.u32 65535, %v1932_v46  ;;  %v1963_v18 = vshrl.u32 %v1932_v46, 16  ;;  %v1940_v0 = vand.u32 65535, %v1936_v13  ;;  %v1941_v56 = vshrl.u32 %v1936_v13, 16 }
 0x36c   : > { %vm2518_vm8 = vcmp.lt.s32.totalorder %v2517_v43, 0  ;;  %v1905_v38 = vshrl.u32 %v2653_v27, %v1904_v55  ;;  %v1926_v1 = vsel %vm1924_vm14, %v1914_v53, 2102212464  ;;  %v2047_v37 = vshrl.u32 %v2046_v45, 23 }
 0x36d   : > { %v1844_v20 = vsel %vm2518_vm8, 0, %v2517_v43  ;;  %v1965_v33 = vmul.u32 %v1963_v18, %v1938_v35  ;;  %v1943_v5 = vmul.u32 %v1941_v56, %v1938_v35  ;;  %v1944_v59 = vmul.u32 %v1940_v0, %v1939_v51 }
 0x36e   : > { %v1845_v28 = vsub.s32 32, %v1844_v20  ;;  %v1849_v41 = vsub.s32 4294967266, %v1844_v20  ;;  %v1846_v50 = vshll.u32 %v1837_v2, %v1844_v20  ;;  %v1966_v2 = vmul.u32 %v1962_v52, %v1939_v51 }
 0x36f   : > { %v1964_v47 = vmul.u32 %v1962_v52, %v1938_v35  ;;  %v1967_v25 = vmul.u32 %v1963_v18, %v1939_v51  ;;  %v1968_v9 = vshll.u32 %v1965_v33, 16  ;;  %v1942_v34 = vmul.u32 %v1940_v0, %v1938_v35 }
 0x370   : > { %v1847_v22 = vshrl.u32 %v1829_v3, %v1845_v28  ;;  %v1850_v48 = vadd.s32 127, %v1849_v41  ;;  %v1946_v4 = vshll.u32 %v1943_v5, 16  ;;  %v1945_v3 = vmul.u32 %v1941_v56, %v1939_v51 }
 0x371   : > { %v1948_v43 = vshll.u32 %v1944_v59, 16  ;;  %v1970_v61 = vshll.u32 %v1966_v2, 16  ;;  %vm1972_vm1 = vc.u32 %v1964_v47, %v1968_v9  ;;  %v1974_v57 = vadd.s32 %v1968_v9, %v1964_v47 }
 0x372   : > { %v1848_v60 = vor.u32 %v1847_v22, %v1846_v50  ;;  %v1851_v17 = vshll.u32 %v1850_v48, 23  ;;  %vm1950_vm13 = vc.u32 %v1942_v34, %v1946_v4  ;;  %v1952_v40 = vadd.s32 %v1946_v4, %v1942_v34 }
 0x373   : > { %v1973_v55 = vsel %vm1972_vm1, 1, %v2650_v21  ;;  %v1951_v53 = vsel %vm1950_vm13, 1, %v2650_v21  ;;  %v1925_v35 = vsel %vm1921_vm12, %v1905_v38, %v3910_v32  ;;  %v1927_v58 = vsel %vm1923_vm0, %v3912_v44, %v1926_v1 }
 0x374   : > { %v1852_v36 = vor.u32 4788187, %v1851_v17  ;;  %v1855_v14 = vcvt.s32.f32 %v1848_v60  ;;  %v1975_v20 = vadd.s32 %v1973_v55, %v1967_v25  ;;  %v1953_v41 = vadd.s32 %v1951_v53, %v1945_v3 }
 0x375   : > { %vm1954_vm3 = vc.u32 %v1952_v40, %v1948_v43  ;;  %vm1976_vm9 = vc.u32 %v1974_v57, %v1970_v61  ;;  %v2522_v49 = vadd.s32 4294967169, %v2047_v37  ;;  %v1947_v50 = vshrl.u32 %v1943_v5, 16 }
 0x376   : > { %v1853_v23 = vand.u32 2147483647, %v1852_v36  ;;  %v1955_v46 = vsel %vm1954_vm3, 1, %v2650_v21  ;;  %v1977_v48 = vsel %vm1976_vm9, 1, %v2650_v21  ;;  %v1969_v10 = vshrl.u32 %v1965_v33, 16 }
 0x377   : > { %v1957_v22 = vadd.s32 %v1955_v46, %v1953_v41  ;;  %v1979_v13 = vadd.s32 %v1977_v48, %v1975_v20  ;;  %v2053_v52 = vadd.s32 1, %v2522_v49  ;;  %v1928_v44 = vsel %vm1922_vm2, %v1925_v35, %v1927_v58 }
 0x378   : > { %v1856_v62 = vmul.f32 %v1855_v14, %v1853_v23  ;;  %v1949_v60 = vshrl.u32 %v1944_v59, 16  ;;  %v1971_v0 = vshrl.u32 %v1966_v2, 16  ;;  %v3978_v56 = vadd.s32 %v1974_v57, %v1970_v61 }
 0x379   : > { %v1958_v17 = vadd.s32 %v1957_v22, %v1947_v50  ;;  %v1980_v45 = vadd.s32 %v1979_v13, %v1969_v10  ;;  %vm2054_vm4 = vcmp.gt.s32.totalorder %v2053_v52, 0  ;;  %v1879_v24 = vand.u32 3, %v1862_v42 }
 0x37a   : > { %v1857_v28 = vxor.u32 2147483648, %v1856_v62  ;;  %v2055_v5 = vsel %vm2054_vm4, %v2053_v52, 0  ;;  %v1982_v2 = vmul.u32 %v3891_v8, %v1928_v44  ;;  %v2051_v4 = vor.u32 8388608, %v3956_v54 }
 0x37b   : > { %v3980_v1 = vadd.s32 %v1958_v17, %v1949_v60  ;;  %v1981_v47 = vadd.s32 %v1980_v45, %v1971_v0  ;;  %v2057_v33 = vand.u32 31, %v2055_v5  ;;  %v3992_v3 = vshrl.u32 %v2055_v5, 5 }
 0x37c   : > { %v1858_v51 = vsel %vm1737_vm7, %v1857_v28, %v1856_v62  ;;  %vm1880_vm5 = vcmp.lt.s32.totalorder %v1879_v24, 2  ;;  %vm1881_vm6 = vcmp.eq.s32.totalorder %v1879_v24, 0  ;;  %v4016_v13 = vshll.u32 %v2051_v4, 8 }
 0x37d   : > { %v1861_v32 = vsel %vm3903_vm11, %v3827_v63, %v1858_v51  ;;  %vm1984_vm15 = vc.u32 %v3980_v1, %v3978_v56  ;;  %v1985_v59 = vadd.s32 1, %v1981_v47  ;;  %v3989_v23 = vsub.s32 32, %v2057_v33 }
 0x37e   : > { %v1863_v18 = vmul.f32 %v1861_v32, %v1861_v32  ;;  %v2060_v61 = vshll.u32 %v2653_v27, %v2057_v33  ;;  %v2063_v54 = vshll.u32 %v2654_v29, %v2057_v33  ;;  %v2066_v55 = vshll.u32 %v2655_v31, %v2057_v33 }
 0x37f   : > { %v1986_v43 = vsel %vm1984_vm15, %v1985_v59, %v1981_v47  ;;  %v2061_v15 = vshrl.u32 %v2654_v29, %v3989_v23  ;;  %v2064_v11 = vshrl.u32 %v2655_v31, %v3989_v23  ;;  %v2067_v40 = vshrl.u32 %v2651_v12, %v3989_v23  ;;  %v1732_v47 = vpop.f32.mrf.mxu3 }
 0x380   : > { %v1864_v36 = vmul.f32 -0.001358992, %v1863_v18  ;;  %v1871_v38 = vmul.f32 -0.00019511016, %v1863_v18  ;;  %v1987_v62 = vadd.s32 %v1986_v43, %v1982_v2  ;;  %v2069_v53 = vshll.u32 %v2651_v12, %v2057_v33 }
 0x381   : > { %v2070_v57 = vshrl.u32 %v2652_v16, %v3989_v23  ;;  %v4006_v35 = vor.u32 %v2061_v15, %v2060_v61  ;;  %v4009_v41 = vor.u32 %v2064_v11, %v2063_v54  ;;  %v2072_v46 = vshll.u32 %v2652_v16, %v2057_v33 }
 0x382   : > { %v1865_v25 = vadd.f32 0.041655596, %v1864_v36  ;;  %v1872_v9 = vadd.f32 0.008332121, %v1871_v38  ;;  %v1988_v28 = vadd.s32 536870912, %v1987_v62  ;;  %v2073_v49 = vshrl.u32 %v2656_v39, %v3989_v23 }
 0x383   : > { %v2071_v58 = vor.u32 %v2070_v57, %v2069_v53  ;;  %v2068_v48 = vor.u32 %v2067_v40, %v2066_v55  ;;  %vm2078_vm7 = vcmp.lt.s32.totalorder %v3992_v3, 4  ;;  %vm2075_vm10 = vcmp.lt.s32.totalorder %v3992_v3, 1 }
 0x384   : > { %v1866_v14 = vmul.f32 %v1865_v25, %v1863_v18  ;;  %v1873_v34 = vmul.f32 %v1872_v9, %v1863_v18  ;;  %v4014_v22 = vshrl.u32 %v1988_v28, 30  ;;  %v2074_v10 = vor.u32 %v2073_v49, %v2072_v46 }
 0x385   : > { %vm2077_vm11 = vcmp.lt.s32.totalorder %v3992_v3, 3  ;;  %v2084_v60 = vsel %vm2078_vm7, %v2071_v58, 920167782  ;;  %v2087_v36 = vsel %vm2075_vm10, %v4009_v41, %v2068_v48  ;;  %vm1884_vm12 = vcmp.eq.s32.totalorder %v1879_v24, 2 }
 0x386   : > { %v1867_v8 = vadd.f32 -0.4999988, %v1866_v14  ;;  %v1874_v42 = vadd.f32 -0.16666654, %v1873_v34  ;;  %v1990_v44 = vshll.u32 %v4014_v22, 30  ;;  %vm2076_vm14 = vcmp.lt.s32.totalorder %v3992_v3, 2 }
 0x387   : > { %v2088_v17 = vsel %vm2078_vm7, %v2074_v10, 1326507024  ;;  %v2085_v38 = vsel %vm2077_vm11, %v2068_v48, %v2084_v60  ;;  %vm1878_vm0 = vweird.f32 %v3827_v63  ;;  %v2092_v43 = vand.u32 65535, %v4016_v13 }
 0x388   : > { %v1868_v20 = vmul.f32 %v1867_v8, %v1863_v18  ;;  %v1875_v37 = vmul.f32 %v1874_v42, %v1863_v18  ;;  %v1991_v45 = vsub.s32 %v1987_v62, %v1990_v44  ;;  %v2089_v5 = vsel %vm2077_vm11, %v2071_v58, %v2088_v17 }
 0x389   : > { %v2090_v14 = vsel %vm2076_vm14, %v2087_v36, %v2089_v5  ;;  %v4049_v61 = vadd.f32 %v1732_v47, %v3915_v6  ;;  %v2093_v24 = vshrl.u32 %v4016_v13, 16  ;;  %v1983_v62 = vadd.s32 %v3978_v56, %v3980_v1 }
 0x38a   : > { %v1869_v51 = vadd.f32 1.0, %v1868_v20  ;;  %v1876_v50 = vadd.f32 1.0, %v1875_v37  ;;  %vm1992_vm8 = vcmp.lt.s32.totalorder %v1991_v45, 0  ;;  %v1993_v9 = vsub.s32 0, %v1991_v45 }
 0x38b   : > { %v2094_v15 = vand.u32 65535, %v2090_v14  ;;  %v2095_v11 = vshrl.u32 %v2090_v14, 16  ;;  %v2059_v6 = vshrl.u32 %v2653_v27, %v3989_v23  ;;  %v2080_v53 = vsel %vm2078_vm7, %v2068_v48, 2102212464 }
 0x38c   : > { %v1877_v52 = vmul.f32 %v1876_v50, %v1861_v32  ;;  %v1885_v18 = vxor.u32 2147483648, %v1869_v51  ;;  %v2083_v32 = vsel %vm2075_vm10, %v4006_v35, %v4009_v41  ;;  %v1994_v4 = vsel %vm1992_vm8, %v1993_v9, %v1991_v45 }
 0x38d   : > { %v2086_v59 = vsel %vm2076_vm14, %v2083_v32, %v2085_v38  ;;  %v1995_v63 = vclz %v1994_v4  ;;  %v2097_v54 = vmul.u32 %v2095_v11, %v2092_v43  ;;  %v2098_v55 = vmul.u32 %v2094_v15, %v2093_v24 }
 0x38e   : > { %v1882_v0 = vxor.u32 2147483648, %v1877_v52  ;;  %v1886_v25 = vsel %vm1884_vm12, %v1885_v18, %v1877_v52  ;;  %v2116_v8 = vand.u32 65535, %v2086_v59  ;;  %v2117_v42 = vshrl.u32 %v2086_v59, 16 }
 0x38f   : > { %v2520_v40 = vadd.s32 4294967294, %v1995_v63  ;;  %v2200_v20 = vand.u32 2139095040, %v4049_v61  ;;  %v2096_v37 = vmul.u32 %v2094_v15, %v2092_v43  ;;  %v2100_v28 = vshll.u32 %v2097_v54, 16 }
 0x390   : > { %v1883_v33 = vsel %vm1881_vm6, %v1869_v51, %v1882_v0  ;;  %v2119_v57 = vmul.u32 %v2117_v42, %v2092_v43  ;;  %v2120_v58 = vmul.u32 %v2116_v8, %v2093_v24  ;;  %v2099_v49 = vmul.u32 %v2095_v11, %v2093_v24 }
 0x391   : > { %v1887_v2 = vsel %vm1880_vm5, %v1883_v33, %v1886_v25  ;;  %vm2521_vm2 = vcmp.lt.s32.totalorder %v2520_v40, 0  ;;  %v2118_v51 = vmul.u32 %v2116_v8, %v2092_v43  ;;  %v2102_v10 = vshll.u32 %v2098_v55, 16 }
 0x392   : > { %v1888_v34 = vsel %vm1878_vm0, nan, %v1887_v2  ;;  %v1998_v46 = vsel %vm2521_vm2, 0, %v2520_v40  ;;  %v2122_v56 = vshll.u32 %v2119_v57, 16  ;;  %vm2104_vm1 = vc.u32 %v2096_v37, %v2100_v28 }
 0x393   : > { %2351 = vst [vmem:[%s4051_s10] sm:$0xff] %v1888_v34  ;;  %v1999_v1 = vsub.s32 32, %v1998_v46  ;;  %v2003_v50 = vsub.s32 4294967266, %v1998_v46  ;;  %v2000_v52 = vshll.u32 %v1991_v45, %v1998_v46  ;;  %v2105_v23 = vsel %vm2104_vm1, 1, %v2650_v21 }
 0x394   : > { %v2106_v18 = vadd.s32 %v2100_v28, %v2096_v37  ;;  %v2121_v48 = vmul.u32 %v2117_v42, %v2093_v24  ;;  %v2107_v17 = vadd.s32 %v2105_v23, %v2099_v49  ;;  %v2124_v0 = vshll.u32 %v2120_v58, 16 }
 0x395   : > { %v2001_v44 = vshrl.u32 %v1983_v62, %v1999_v1  ;;  %v2004_v60 = vadd.s32 127, %v2003_v50  ;;  %vm2126_vm3 = vc.u32 %v2118_v51, %v2122_v56  ;;  %v2128_v32 = vadd.s32 %v2122_v56, %v2118_v51 }
 0x396   : > { %vm2108_vm13 = vc.u32 %v2106_v18, %v2102_v10  ;;  %v2201_v36 = vshrl.u32 %v2200_v20, 23  ;;  %v2127_v33 = vsel %vm2126_vm3, 1, %v2650_v21  ;;  %v2101_v25 = vshrl.u32 %v2097_v54, 16 }
 0x397   : > { %v2002_v38 = vor.u32 %v2001_v44, %v2000_v52  ;;  %v2005_v5 = vshll.u32 %v2004_v60, 23  ;;  %v2109_v47 = vsel %vm2108_vm13, 1, %v2650_v21  ;;  %v2129_v9 = vadd.s32 %v2127_v33, %v2121_v48 }
 0x398   : > { %v2111_v45 = vadd.s32 %v2109_v47, %v2107_v17  ;;  %vm2130_vm9 = vc.u32 %v2128_v32, %v2124_v0  ;;  %v2079_v59 = vsel %vm2075_vm10, %v2059_v6, %v4006_v35  ;;  %v2525_v34 = vadd.s32 4294967169, %v2201_v36 }
 0x399   : > { %v2006_v2 = vor.u32 4788187, %v2005_v5  ;;  %v2131_v14 = vsel %vm2130_vm9, 1, %v2650_v21  ;;  %v2103_v4 = vshrl.u32 %v2098_v55, 16  ;;  %v2123_v63 = vshrl.u32 %v2119_v57, 16 }
 0x39a   : > { %v2112_v43 = vadd.s32 %v2111_v45, %v2101_v25  ;;  %v2133_v24 = vadd.s32 %v2131_v14, %v2129_v9  ;;  %v2009_v11 = vcvt.s32.f32 %v2002_v38  ;;  %v2081_v8 = vsel %vm2077_vm11, %v4009_v41, %v2080_v53 }
 0x39b   : > { %v2007_v15 = vand.u32 2147483647, %v2006_v2  ;;  %v2207_v42 = vadd.s32 1, %v2525_v34  ;;  %v2013_v62 = vsub.s32 4, %v4014_v22  ;;  %v2125_v54 = vshrl.u32 %v2120_v58, 16 }
 0x39c   : > { %v4073_v40 = vadd.s32 %v2112_v43, %v2103_v4  ;;  %v2134_v35 = vadd.s32 %v2133_v24, %v2123_v63  ;;  %v4075_v20 = vadd.s32 %v2128_v32, %v2124_v0  ;;  %v2082_v55 = vsel %vm2076_vm14, %v2079_v59, %v2081_v8 }
 0x39d   : > { %v2010_v6 = vmul.f32 %v2009_v11, %v2007_v15  ;;  %vm2208_vm4 = vcmp.gt.s32.totalorder %v2207_v42, 0  ;;  %vm1891_vm15 = vcmp.lt.s32.totalorder %v3883_v19, 0  ;;  %v2197_v46 = vand.u32 2147483647, %v4049_v61 }
 0x39e   : > { %v2135_v57 = vadd.s32 %v2134_v35, %v2125_v54  ;;  %v2209_v37 = vsel %vm2208_vm4, %v2207_v42, 0  ;;  %vm2138_vm5 = vc.u32 %v4073_v40, %v4075_v20  ;;  %v2014_v53 = vsel %vm1891_vm15, %v2013_v62, %v4014_v22 }
 0x39f   : > { %v2011_v28 = vxor.u32 2147483648, %v2010_v6  ;;  %v2211_v41 = vand.u32 31, %v2209_v37  ;;  %vm4086_vm6 = vcmp.le.f32.partialorder %v1889_v26, 0.7853982  ;;  %v2136_v51 = vmul.u32 %v4016_v13, %v2082_v55 }
 0x3a0   : > { %v2139_v58 = vadd.s32 1, %v2135_v57  ;;  %v2016_v22 = vsel %vm4086_vm6, 0, %v2014_v53  ;;  %v2204_v26 = vand.u32 8388607, %v2197_v46  ;;  %v4100_v23 = vshrl.u32 %v2209_v37, 5 }
 0x3a1   : > { %v2012_v3 = vsel %vm1891_vm15, %v2011_v28, %v2010_v6  ;;  %v4091_v56 = vsub.s32 32, %v2211_v41  ;;  %v2223_v18 = vshll.u32 %v2651_v12, %v2211_v41  ;;  %v2214_v0 = vshll.u32 %v2653_v27, %v2211_v41 }
 0x3a2   : > { %v2015_v1 = vsel %vm4086_vm6, %v3883_v19, %v2012_v3  ;;  %v2140_v50 = vsel %vm2138_vm5, %v2139_v58, %v2135_v57  ;;  %v2205_v45 = vor.u32 8388608, %v2204_v26  ;;  %v2217_v9 = vshll.u32 %v2654_v29, %v2211_v41 }
 0x3a3   : > { %v2017_v10 = vmul.f32 %v2015_v1, %v2015_v1  ;;  %v2141_v52 = vadd.s32 %v2140_v50, %v2136_v51  ;;  %v2224_v13 = vshrl.u32 %v2652_v16, %v4091_v56  ;;  %v2215_v17 = vshrl.u32 %v2654_v29, %v4091_v56 }
 0x3a4   : > { %v2218_v32 = vshrl.u32 %v2655_v31, %v4091_v56  ;;  %v2221_v36 = vshrl.u32 %v2651_v12, %v4091_v56  ;;  %v2227_v38 = vshrl.u32 %v2656_v39, %v4091_v56  ;;  %v2220_v2 = vshll.u32 %v2655_v31, %v2211_v41 }
 0x3a5   : > { %v2018_v48 = vmul.f32 -0.001358992, %v2017_v10  ;;  %v2025_v44 = vmul.f32 -0.00019511016, %v2017_v10  ;;  %v2142_v60 = vadd.s32 536870912, %v2141_v52  ;;  %v2225_v25 = vor.u32 %v2224_v13, %v2223_v18 }
 0x3a6   : > { %v2226_v59 = vshll.u32 %v2652_v16, %v2211_v41  ;;  %v4120_v12 = vor.u32 %v2215_v17, %v2214_v0  ;;  %v4122_v43 = vor.u32 %v2218_v32, %v2217_v9  ;;  %v4124_v39 = vor.u32 %v2221_v36, %v2220_v2 }
 0x3a7   : > { %v2019_v5 = vadd.f32 0.041655596, %v2018_v48  ;;  %v2026_v47 = vadd.f32 0.008332121, %v2025_v44  ;;  %v4114_v33 = vshrl.u32 %v2142_v60, 30  ;;  %vm2232_vm7 = vcmp.lt.s32.totalorder %v4100_v23, 4 }
 0x3a8   : > { %v2228_v63 = vor.u32 %v2227_v38, %v2226_v59  ;;  %v2238_v31 = vsel %vm2232_vm7, %v2225_v25, 920167782  ;;  %v2033_v16 = vand.u32 3, %v2016_v22  ;;  %vm2229_vm10 = vcmp.lt.s32.totalorder %v4100_v23, 1 }
 0x3a9   : > { %v2020_v14 = vmul.f32 %v2019_v5, %v2017_v10  ;;  %v2027_v34 = vmul.f32 %v2026_v47, %v2017_v10  ;;  %v2144_v4 = vshll.u32 %v4114_v33, 30  ;;  %vm2231_vm11 = vcmp.lt.s32.totalorder %v4100_v23, 3 }
 0x3aa   : > { %v4131_v11 = vshll.u32 %v2205_v45, 8  ;;  %v2237_v54 = vsel %vm2229_vm10, %v4120_v12, %v4122_v43  ;;  %v2239_v35 = vsel %vm2231_vm11, %v4124_v39, %v2238_v31  ;;  %v2241_v6 = vsel %vm2229_vm10, %v4122_v43, %v4124_v39 }
 0x3ab   : > { %v2021_v24 = vadd.f32 -0.4999988, %v2020_v14  ;;  %v2028_v15 = vadd.f32 -0.16666654, %v2027_v34  ;;  %v2145_v29 = vsub.s32 %v2141_v52, %v2144_v4  ;;  %v2242_v55 = vsel %vm2232_vm7, %v2228_v63, 1326507024 }
 0x3ac   : > { %v2243_v41 = vsel %vm2231_vm11, %v2225_v25, %v2242_v55  ;;  %vm2032_vm14 = vweird.f32 %v3883_v19  ;;  %vm2034_vm8 = vcmp.lt.s32.totalorder %v2033_v16, 2  ;;  %vm2230_vm0 = vcmp.lt.s32.totalorder %v4100_v23, 2 }
 0x3ad   : > { %v2022_v8 = vmul.f32 %v2021_v24, %v2017_v10  ;;  %v2029_v42 = vmul.f32 %v2028_v15, %v2017_v10  ;;  %vm2146_vm12 = vcmp.lt.s32.totalorder %v2145_v29, 0  ;;  %v2147_v62 = vsub.s32 0, %v2145_v29 }
 0x3ae   : > { %v2240_v3 = vsel %vm2230_vm0, %v2237_v54, %v2239_v35  ;;  %v2244_v51 = vsel %vm2230_vm0, %v2241_v6, %v2243_v41  ;;  %v2246_v22 = vand.u32 65535, %v4131_v11  ;;  %vm2035_vm2 = vcmp.eq.s32.totalorder %v2033_v16, 0 }
 0x3af   : > { %v2023_v57 = vadd.f32 1.0, %v2022_v8  ;;  %v2030_v37 = vadd.f32 1.0, %v2029_v42  ;;  %v2148_v28 = vsel %vm2146_vm12, %v2147_v62, %v2145_v29  ;;  %v2248_v10 = vand.u32 65535, %v2244_v51 }
 0x3b0   : > { %v2149_v53 = vclz %v2148_v28  ;;  %v2249_v52 = vshrl.u32 %v2244_v51, 16  ;;  %vm2038_vm1 = vcmp.eq.s32.totalorder %v2033_v16, 2  ;;  %v2247_v18 = vshrl.u32 %v4131_v11, 16 }
 0x3b1   : > { %v2031_v58 = vmul.f32 %v2030_v37, %v2015_v1  ;;  %v2039_v49 = vxor.u32 2147483648, %v2023_v57  ;;  %v2271_v48 = vshrl.u32 %v2240_v3, 16  ;;  %v2270_v0 = vand.u32 65535, %v2240_v3 }
 0x3b2   : > { %v2523_v50 = vadd.s32 4294967294, %v2149_v53  ;;  %v2251_v1 = vmul.u32 %v2249_v52, %v2246_v22  ;;  %v2252_v17 = vmul.u32 %v2248_v10, %v2247_v18  ;;  %v2137_v36 = vadd.s32 %v4075_v20, %v4073_v40 }
 0x3b3   : > { %v2036_v26 = vxor.u32 2147483648, %v2031_v58  ;;  %v2040_v13 = vsel %vm2038_vm1, %v2039_v49, %v2031_v58  ;;  %v2250_v25 = vmul.u32 %v2248_v10, %v2246_v22  ;;  %v2253_v45 = vmul.u32 %v2249_v52, %v2247_v18 }
 0x3b4   : > { %vm2524_vm13 = vcmp.lt.s32.totalorder %v2523_v50, 0  ;;  %v2254_v9 = vshll.u32 %v2251_v1, 16  ;;  %v2273_v34 = vmul.u32 %v2271_v48, %v2246_v22  ;;  %v2256_v4 = vshll.u32 %v2252_v17, 16 }
 0x3b5   : > { %v2037_v44 = vsel %vm2035_vm2, %v2023_v57, %v2036_v26  ;;  %v2152_v60 = vsel %vm2524_vm13, 0, %v2523_v50  ;;  %v2274_v24 = vmul.u32 %v2270_v0, %v2247_v18  ;;  %v2272_v19 = vmul.u32 %v2270_v0, %v2246_v22 }
 0x3b6   : > { %v2041_v32 = vsel %vm2034_vm8, %v2037_v44, %v2040_v13  ;;  %v2153_v38 = vsub.s32 32, %v2152_v60  ;;  %v2157_v5 = vsub.s32 4294967266, %v2152_v60  ;;  %v2154_v2 = vshll.u32 %v2145_v29, %v2152_v60 }
 0x3b7   : > { %v2042_v47 = vsel %vm2032_vm14, nan, %v2041_v32  ;;  %vm2258_vm3 = vc.u32 %v2250_v25, %v2254_v9  ;;  %v2260_v63 = vadd.s32 %v2254_v9, %v2250_v25  ;;  %v2276_v20 = vshll.u32 %v2273_v34, 16 }
 0x3b8   : > { %2352 = vst [vmem:[%s4051_s10 + $0x8] sm:$0xff] %v2042_v47  ;;  %v2155_v59 = vshrl.u32 %v2137_v36, %v2153_v38  ;;  %v2158_v14 = vadd.s32 127, %v2157_v5  ;;  %v2259_v40 = vsel %vm2258_vm3, 1, %v2650_v21  ;;  %v2255_v42 = vshrl.u32 %v2251_v1, 16 }
 0x3b9   : > { %v2261_v16 = vadd.s32 %v2259_v40, %v2253_v45  ;;  %vm2262_vm9 = vc.u32 %v2260_v63, %v2256_v4  ;;  %v2275_v29 = vmul.u32 %v2271_v48, %v2247_v18  ;;  %v2278_v35 = vshll.u32 %v2274_v24, 16 }
 0x3ba   : > { %v2156_v15 = vor.u32 %v2155_v59, %v2154_v2  ;;  %v2159_v31 = vshll.u32 %v2158_v14, 23  ;;  %v2263_v62 = vsel %vm2262_vm9, 1, %v2650_v21  ;;  %vm2280_vm4 = vc.u32 %v2272_v19, %v2276_v20 }
 0x3bb   : > { %v2265_v54 = vadd.s32 %v2263_v62, %v2261_v16  ;;  %v2282_v6 = vadd.s32 %v2276_v20, %v2272_v19  ;;  %v2281_v37 = vsel %vm2280_vm4, 1, %v2650_v21  ;;  %v2234_v28 = vsel %vm2232_vm7, %v4124_v39, 2102212464 }
 0x3bc   : > { %v2160_v8 = vor.u32 4788187, %v2159_v31  ;;  %v2163_v57 = vcvt.s32.f32 %v2156_v15  ;;  %v2283_v53 = vadd.s32 %v2281_v37, %v2275_v29  ;;  %v2213_v49 = vshrl.u32 %v2653_v27, %v4091_v56 }
 0x3bd   : > { %v2266_v41 = vadd.s32 %v2265_v54, %v2255_v42  ;;  %vm2284_vm15 = vc.u32 %v2282_v6, %v2278_v35  ;;  %v2257_v3 = vshrl.u32 %v2252_v17, 16  ;;  %v2277_v50 = vshrl.u32 %v2273_v34, 16 }
 0x3be   : > { %v2161_v55 = vand.u32 2147483647, %v2160_v8  ;;  %v2285_v51 = vsel %vm2284_vm15, 1, %v2650_v21  ;;  %v2233_v52 = vsel %vm2229_vm10, %v2213_v49, %v4120_v12  ;;  %v2235_v39 = vsel %vm2231_vm11, %v4122_v43, %v2234_v28 }
 0x3bf   : > { %v2287_v22 = vadd.s32 %v2285_v51, %v2283_v53  ;;  %v2267_v26 = vadd.s32 %v2266_v41, %v2257_v3  ;;  %vm2045_vm5 = vcmp.lt.s32.totalorder %v3920_v7, 0  ;;  %v2279_v18 = vshrl.u32 %v2274_v24, 16 }
 0x3c0   : > { %v2164_v58 = vmul.f32 %v2163_v57, %v2161_v55  ;;  %vm4180_vm6 = vcmp.le.f32.partialorder %v2043_v30, 0.7853982  ;;  %v2286_v56 = vadd.s32 %v2282_v6, %v2278_v35  ;;  %v2236_v43 = vsel %vm2230_vm0, %v2233_v52, %v2235_v39 }
 0x3c1   : > { %v2288_v13 = vadd.s32 %v2287_v22, %v2277_v50  ;;  %v2290_v17 = vmul.u32 %v4131_v11, %v2236_v43  ;;  %v2167_v0 = vsub.s32 4, %v4114_v33  ;;  %vm2186_vm8 = vweird.f32 %v3920_v7 }
 0x3c2   : > { %v2165_v10 = vxor.u32 2147483648, %v2164_v58  ;;  %vm2292_vm7 = vc.u32 %v2267_v26, %v2286_v56  ;;  %v2291_v55 = vadd.s32 %v2286_v56, %v2267_v26  ;;  %vm2199_vm2 = vcmp.lt.s32.totalorder %v4049_v61, 0 }
 0x3c3   : > { %v2289_v1 = vadd.s32 %v2288_v13, %v2279_v18  ;;  %v2168_v23 = vsel %vm2045_vm5, %v2167_v0, %v4114_v33  ;;  %vm4203_vm1 = vcmp.le.f32.partialorder %v2197_v46, 0.7853982  ;;  %vm2340_vm4 = vweird.f32 %v4049_v61 }
 0x3c4   : > { %v2166_v27 = vsel %vm2045_vm5, %v2165_v10, %v2164_v58  ;;  %v2170_v14 = vsel %vm4180_vm6, 0, %v2168_v23 }
 0x3c5   : > { %v2169_v12 = vsel %vm4180_vm6, %v3920_v7, %v2166_v27  ;;  %v2293_v44 = vadd.s32 1, %v2289_v1  ;;  %v2187_v31 = vand.u32 3, %v2170_v14 }
 0x3c6   : > { %v2171_v48 = vmul.f32 %v2169_v12, %v2169_v12 }
 0x3c7   : > { %v2294_v32 = vsel %vm2292_vm7, %v2293_v44, %v2289_v1  ;;  %vm2189_vm11 = vcmp.eq.s32.totalorder %v2187_v31, 0  ;;  %vm2192_vm12 = vcmp.eq.s32.totalorder %v2187_v31, 2  ;;  %vm2188_vm14 = vcmp.lt.s32.totalorder %v2187_v31, 2 }
 0x3c8   : > { %v2172_v60 = vmul.f32 -0.001358992, %v2171_v48  ;;  %v2179_v30 = vmul.f32 -0.00019511016, %v2171_v48  ;;  %v2295_v5 = vadd.s32 %v2294_v32, %v2290_v17 }
 0x3ca   : > { %v2173_v36 = vadd.f32 0.041655596, %v2172_v60  ;;  %v2180_v38 = vadd.f32 0.008332121, %v2179_v30  ;;  %v2296_v45 = vadd.s32 536870912, %v2295_v5 }
 0x3cc   : > { %v2174_v47 = vmul.f32 %v2173_v36, %v2171_v48  ;;  %v2181_v25 = vmul.f32 %v2180_v38, %v2171_v48  ;;  %v2297_v59 = vshrl.u32 %v2296_v45, 30 }
 0x3ce   : > { %v2175_v9 = vadd.f32 -0.4999988, %v2174_v47  ;;  %v2182_v2 = vadd.f32 -0.16666654, %v2181_v25  ;;  %v2298_v4 = vshll.u32 %v2297_v59, 30  ;;  %v2321_v21 = vsub.s32 4, %v2297_v59 }
 0x3d0   : > { %v2176_v11 = vmul.f32 %v2175_v9, %v2171_v48  ;;  %v2183_v34 = vmul.f32 %v2182_v2, %v2171_v48  ;;  %v2299_v15 = vsub.s32 %v2295_v5, %v2298_v4  ;;  %v2322_v1 = vsel %vm2199_vm2, %v2321_v21, %v2297_v59 }
 0x3d1   : > { %v2324_v44 = vsel %vm4203_vm1, 0, %v2322_v1 }
 0x3d2   : > { %v2177_v63 = vadd.f32 1.0, %v2176_v11  ;;  %v2184_v24 = vadd.f32 1.0, %v2183_v34  ;;  %vm2300_vm10 = vcmp.lt.s32.totalorder %v2299_v15, 0  ;;  %v2301_v16 = vsub.s32 0, %v2299_v15 }
 0x3d3   : > { %v2341_v32 = vand.u32 3, %v2324_v44 }
 0x3d4   : > { %v2185_v40 = vmul.f32 %v2184_v24, %v2169_v12  ;;  %v2193_v20 = vxor.u32 2147483648, %v2177_v63  ;;  %v2302_v33 = vsel %vm2300_vm10, %v2301_v16, %v2299_v15 }
 0x3d5   : > { %v2303_v8 = vclz %v2302_v33  ;;  %vm2343_vm13 = vcmp.eq.s32.totalorder %v2341_v32, 0  ;;  %vm2346_vm3 = vcmp.eq.s32.totalorder %v2341_v32, 2  ;;  %vm2342_vm9 = vcmp.lt.s32.totalorder %v2341_v32, 2 }
 0x3d6   : > { %v2190_v19 = vxor.u32 2147483648, %v2185_v40  ;;  %v2194_v62 = vsel %vm2192_vm12, %v2193_v20, %v2185_v40 }
 0x3d7   : > { %v2526_v54 = vadd.s32 4294967294, %v2303_v8 }
 0x3d8   : > { %v2191_v42 = vsel %vm2189_vm11, %v2177_v63, %v2190_v19 }
 0x3d9   : > { %v2195_v29 = vsel %vm2188_vm14, %v2191_v42, %v2194_v62  ;;  %vm2527_vm0 = vcmp.lt.s32.totalorder %v2526_v54, 0 }
 0x3da   : > { %v2196_v35 = vsel %vm2186_vm8, nan, %v2195_v29  ;;  %v2306_v6 = vsel %vm2527_vm0, 0, %v2526_v54 }
 0x3db   : > { %2353 = vst [vmem:[%s4051_s10 + $0x10] sm:$0xff] %v2196_v35  ;;  %v2307_v57 = vsub.s32 32, %v2306_v6  ;;  %v2311_v37 = vsub.s32 4294967266, %v2306_v6  ;;  %v2308_v28 = vshll.u32 %v2299_v15, %v2306_v6 }
 0x3dd   : > { %v2309_v41 = vshrl.u32 %v2291_v55, %v2307_v57  ;;  %v2312_v53 = vadd.s32 127, %v2311_v37 }
 0x3df   : > { %v2310_v58 = vor.u32 %v2309_v41, %v2308_v28  ;;  %v2313_v49 = vshll.u32 %v2312_v53, 23 }
 0x3e1   : > { %v2314_v3 = vor.u32 4788187, %v2313_v49  ;;  %v2317_v50 = vcvt.s32.f32 %v2310_v58 }
 0x3e3   : > { %v2315_v51 = vand.u32 2147483647, %v2314_v3 }
 0x3e5   : > { %v2318_v22 = vmul.f32 %v2317_v50, %v2315_v51 }
 0x3e7   : > { %v2319_v10 = vxor.u32 2147483648, %v2318_v22 }
 0x3e9   : > { %v2320_v52 = vsel %vm2199_vm2, %v2319_v10, %v2318_v22 }
 0x3ea   : > { %v2323_v39 = vsel %vm4203_vm1, %v4049_v61, %v2320_v52 }
 0x3eb   : > { %v2325_v26 = vmul.f32 %v2323_v39, %v2323_v39 }
 0x3ed   : > { %v2326_v18 = vmul.f32 -0.001358992, %v2325_v26  ;;  %v2333_v13 = vmul.f32 -0.00019511016, %v2325_v26 }
 0x3ef   : > { %v2327_v27 = vadd.f32 0.041655596, %v2326_v18  ;;  %v2334_v56 = vadd.f32 0.008332121, %v2333_v13 }
 0x3f1   : > { %v2328_v12 = vmul.f32 %v2327_v27, %v2325_v26  ;;  %v2335_v43 = vmul.f32 %v2334_v56, %v2325_v26 }
 0x3f3   : > { %v2329_v48 = vadd.f32 -0.4999988, %v2328_v12  ;;  %v2336_v46 = vadd.f32 -0.16666654, %v2335_v43 }
 0x3f5   : > { %v2330_v60 = vmul.f32 %v2329_v48, %v2325_v26  ;;  %v2337_v30 = vmul.f32 %v2336_v46, %v2325_v26 }
 0x3f7   : > { %v2331_v17 = vadd.f32 1.0, %v2330_v60  ;;  %v2338_v0 = vadd.f32 1.0, %v2337_v30 }
 0x3f9   : > { %v2339_v36 = vmul.f32 %v2338_v0, %v2323_v39  ;;  %v2347_v38 = vxor.u32 2147483648, %v2331_v17 }
 0x3fb   : > { %v2344_v5 = vxor.u32 2147483648, %v2339_v36  ;;  %v2348_v25 = vsel %vm2346_vm3, %v2347_v38, %v2339_v36 }
 0x3fd   : > { %v2345_v47 = vsel %vm2343_vm13, %v2331_v17, %v2344_v5 }
 0x3fe   : > { %v2349_v45 = vsel %vm2342_vm9, %v2345_v47, %v2348_v25 }
 0x3ff   : > { %v2350_v23 = vsel %vm2340_vm4, nan, %v2349_v45 }
 0x400   : > { %2354 = vst [vmem:[%s4051_s10 + $0x18] sm:$0xff] %v2350_v23 }
 0x401   : > { %2613 = shalt.err (!%p2610_p3)
}
 0x402   : > { %s2657_s6 = smov 256   ;;  %s2658_s7 = smov 512  }
 0x403   : > { %s2659_s8 = smov 16  }
 0x404   : > { %2534 = dma.vmem_to_hbm [thread:$0]  (%p2718_p5), %s4217_s24, 512, %s2371_s25, %s2356_s16, %s2657_s6, %s2658_s7, %s2659_s8  }
 0x405 PF: > { %p2540_p4 = scmp.ge.s32.totalorder %s2648_s15, 2  ;;  %s2385_s9 = sand.u32 1, %s2636_s12  }
 0x406   : > { %s2386_s10 = scalar_lea.sflag [#allocation3], %s2385_s9 }
 0x407   : > { %p2537_p7 = pnand %p2540_p4, %p2722_p6 }
 0x409   : > { %p2538_p8 = pneg %p2537_p7 }
 0x40b   : > { %2631 = dma.done.wait (%p2538_p8), %s2386_s10, 512  }
 0x40c   : > { %2633 = vsyncadd (%p2538_p8), %s2386_s10, 4294966784  ;;  %p13_p9 = scmp.ge.s32.totalorder %s2705_s18, 4   ;;  %s4281_s12 = smov %s2640_s13 }
 0x40d   : > { %s4282_s13 = smov %s2644_s14  ;;  %s4283_s14 = smov %s2716_s21 }
 0x40e   : > { %s4284_s15 = smov %s2705_s18  ;;  %15 = sbr.rel (!%p13_p9) target bundleno = 3 (0x3), region = 71 }
 0x413   :  { %2392 = vsyncpa [#allocation3], 1 }
 0x414   :  { %2394 = vsyncpa [#allocation3 + $0x1], 1 }

</bundles_post_ra>
